<compile_context>
chip_gen: v5e
topology: v5e:2x2
jax: 0.10.0
libtpu: 0.0.40
codegen_flags: <defaults>
</compile_context>

<pallas_src>
import jax
import jax.numpy as jnp
from jax import lax
from jax.experimental import pallas as pl
from jax.experimental.pallas import tpu as pltpu

D_IN = 768                    # model_size == 'base'
HIDDEN = 32                   # args['hidden_size']
N_CLASSES = {'a': 6, 'b': 7, 'c': 2, 'd': 4, 'e': 4}
BN_EPS = 1e-5
VOCAB = 1000
OUT_PAD = 128                 # lane-dense padded logits width


# ----------------------------------------------------------------------------
# Fused Pallas kernel: all 5 heads, one per grid step.
#   emb_ref : [S*B, D]      bf16  (shared across the grid)
#   wih_ref : [1, D, 8H]    bf16  (fwd+bwd input proj, gate-major/dir-minor)
#   gxb_ref : [1, 1, 8H]    f32   (b_ih + b_hh, both directions)
#   whh_ref : [1, 2H, 8H]   f32   (block-diagonal over direction)
#   cm_ref  : [1, 2H, 128]  f32   (Conv1d+BN folded banded matrix, zero padded)
#   cb_ref  : [1, 1, 128]   f32   (Conv1d+BN folded bias row)
#   lw_ref  : [1, 128, 128] f32   (classifier weights, zero padded)
#   lb_ref  : [1, 1, 128]   f32   (classifier bias, zero padded)
#   out_ref : [1, B, 128]   f32   (padded logits)
#   gx_ref  : [S*B, 8H]     f32   VMEM scratch for precomputed gate inputs
# ----------------------------------------------------------------------------
def _mtl_heads_kernel(emb_ref, wih_ref, gxb_ref, whh_ref, cm_ref, cb_ref,
                      lw_ref, lb_ref, out_ref, gx_ref):
    SB, _ = emb_ref.shape
    _, B, _ = out_ref.shape
    S = SB // B
    G = gx_ref.shape[1]          # 8H  (both directions, gate-major)
    H2 = G // 4                  # 2H  (one gate, both directions)
    H = H2 // 2                  # H

    # (1) Hoisted input projection: one big bf16 MXU matmul, f32 accumulate,
    #     gate bias folded in.  Stored to VMEM scratch, reused by every step.
    gx_ref[...] = (jnp.dot(emb_ref[...], wih_ref[0],
                           preferred_element_type=jnp.float32) + gxb_ref[0])

    # Hoisted lane masks (built once; reused by all unrolled steps).
    lane = lax.broadcasted_iota(jnp.int32, (B, G), 1)
    fwd_mask = (lane % H2) < H                       # forward-direction lanes
    g_mask = (lane >= 2 * H2) & (lane < 3 * H2)      # 'g' gate block -> tanh

    whh = whh_ref[0]                                 # [2H, 8H]

    # (2) Fused forward/backward recurrence.  PyTorch gate order i, f, g, o.
    #     Carry layout: h, c = [B, 2H] with [forward H | backward H].
    def step(t, carry):
        h, c = carry
        g_fwd = gx_ref[pl.ds(B * t, B)]              # time t        (fwd dir)
        g_bwd = gx_ref[pl.ds(B * (S - 1 - t), B)]    # time S-1-t    (bwd dir)
        gates = (jnp.where(fwd_mask, g_fwd, g_bwd)
                 + jnp.dot(h, whh, preferred_element_type=jnp.float32))
        # Full-width transcendentals (EUP) + one lane select instead of four
        # 32-lane sub-vreg slices of the pre-activations.
        act = jnp.where(g_mask, jnp.tanh(gates), jax.nn.sigmoid(gates))
        i_g = act[:, 0 * H2:1 * H2]
        f_g = act[:, 1 * H2:2 * H2]
        g_g = act[:, 2 * H2:3 * H2]
        o_g = act[:, 3 * H2:4 * H2]
        c_new = f_g * c + i_g * g_g
        h_new = o_g * jnp.tanh(c_new)
        return h_new, c_new

    h0 = jnp.zeros((B, H2), jnp.float32)
    c0 = jnp.zeros((B, H2), jnp.float32)
    h_cat, _ = lax.fori_loop(0, S, step, (h0, c0), unroll=True)  # [B, 2H]

    # (3) Conv1d(2->1, k=3, pad=1) + BatchNorm folded into one banded matmul,
    #     then ReLU and the classifier, all at 128-lane width.
    conv = (jnp.dot(h_cat, cm_ref[0], preferred_element_type=jnp.float32)
            + cb_ref[0])
    act = jnp.maximum(conv, 0.0)          # nn.Dropout = identity in eval mode
    out_ref[0] = (jnp.dot(act, lw_ref[0], preferred_element_type=jnp.float32)
                  + lb_ref[0])


def mtl_heads_pallas(embs_bsd, hp):
    """Run all five task heads in one fused pallas_call; returns [5, B, 128]."""
    B, S, D = embs_bsd.shape
    H = HIDDEN
    n_tasks = hp['wih'].shape[0]
    # One time-major flatten + bf16 cast for the whole call (not per task).
    emb = jnp.transpose(embs_bsd, (1, 0, 2)).reshape(S * B, D).astype(jnp.bfloat16)

    return pl.pallas_call(
        _mtl_heads_kernel,
        out_shape=jax.ShapeDtypeStruct((n_tasks, B, OUT_PAD), jnp.float32),
        grid=(n_tasks,),
        in_specs=[
            pl.BlockSpec((S * B, D), lambda t: (0, 0)),            # emb (shared)
            pl.BlockSpec((1, D, 8 * H), lambda t: (t, 0, 0)),      # W_ih (bf16)
            pl.BlockSpec((1, 1, 8 * H), lambda t: (t, 0, 0)),      # gate bias
            pl.BlockSpec((1, 2 * H, 8 * H), lambda t: (t, 0, 0)),  # W_hh
            pl.BlockSpec((1, 2 * H, OUT_PAD), lambda t: (t, 0, 0)),  # conv+BN mat
            pl.BlockSpec((1, 1, OUT_PAD), lambda t: (t, 0, 0)),      # conv+BN bias
            pl.BlockSpec((1, OUT_PAD, OUT_PAD), lambda t: (t, 0, 0)),  # lin W
            pl.BlockSpec((1, 1, OUT_PAD), lambda t: (t, 0, 0)),        # lin b
        ],
        out_specs=pl.BlockSpec((1, B, OUT_PAD), lambda t: (t, 0, 0)),
        scratch_shapes=[pltpu.VMEM((S * B, 8 * H), jnp.float32)],
        compiler_params=pltpu.CompilerParams(
            dimension_semantics=("parallel",),   # shards the 5 heads on v7x
            vmem_limit_bytes=32 * 1024 * 1024,
        ),
    )(emb, hp['wih'], hp['gxb'], hp['whh'], hp['conv_mat'], hp['conv_bias'],
      hp['lin_w'], hp['lin_b'])


# ----------------------------------------------------------------------------
# Host-side weight preparation (done once): permute to gate-major /
# direction-minor layout, fold BatchNorm into the Conv1d, express the Conv1d
# as a banded matrix, zero-pad classifier to lane-dense 128, stack over tasks.
# ----------------------------------------------------------------------------
def prepare_head_params(params):
    H = HIDDEN
    u = jnp.arange(H)[:, None]
    l = jnp.arange(H)[None, :]
    wih_l, gxb_l, whh_l, cm_l, cb_l, lw_l, lb_l = [], [], [], [], [], [], []

    for task in 'abcde':
        tp = params[task]
        # Input projection, columns ordered (gate q, direction d, unit u).
        wf = tp['wih_f'].T.reshape(D_IN, 4, 1, H)
        wb = tp['wih_b'].T.reshape(D_IN, 4, 1, H)
        wih_l.append(jnp.concatenate([wf, wb], axis=2).reshape(D_IN, 8 * H))
        bf = (tp['bih_f'] + tp['bhh_f']).reshape(4, 1, H)
        bb = (tp['bih_b'] + tp['bhh_b']).reshape(4, 1, H)
        gxb_l.append(jnp.concatenate([bf, bb], axis=1).reshape(1, 8 * H))
        # Recurrent weights, block-diagonal over direction, same column order.
        hf = tp['whh_f'].T.reshape(H, 4, 1, H)
        hb = tp['whh_b'].T.reshape(H, 4, 1, H)
        z = jnp.zeros_like(hf)
        whh_l.append(jnp.concatenate([
            jnp.concatenate([hf, z], axis=2).reshape(H, 8 * H),
            jnp.concatenate([z, hb], axis=2).reshape(H, 8 * H)], axis=0))
        # Conv1d(2,1,k=3,p=1) + BatchNorm1d(eval) folded into a banded matrix.
        scale = tp['bn_gamma'][0] * lax.rsqrt(tp['bn_var'][0] + BN_EPS)
        w = tp['conv_w'][0] * scale                              # [2, 3]
        cbias = scale * (tp['conv_b'][0] - tp['bn_mean'][0]) + tp['bn_beta'][0]

        def band(wd):
            return (wd[0] * (u == l - 1) + wd[1] * (u == l)
                    + wd[2] * (u == l + 1)).astype(jnp.float32)

        cm = jnp.concatenate([band(w[0]), band(w[1])], axis=0)   # [2H, H]
        cm_l.append(jnp.pad(cm, ((0, 0), (0, OUT_PAD - H))))
        cb_l.append(jnp.pad(jnp.full((1, H), cbias, jnp.float32),
                            ((0, 0), (0, OUT_PAD - H))))
        # Classifier, zero-padded to a lane-dense [128, 128] / [1, 128].
        n_out = tp['lin_w'].shape[0]
        lw = jnp.zeros((OUT_PAD, OUT_PAD), jnp.float32).at[:H, :n_out].set(
            tp['lin_w'].T)
        lb = jnp.zeros((1, OUT_PAD), jnp.float32).at[0, :n_out].set(tp['lin_b'])
        lw_l.append(lw)
        lb_l.append(lb)

    return dict(
        wih=jnp.stack(wih_l).astype(jnp.bfloat16),
        gxb=jnp.stack(gxb_l),
        whh=jnp.stack(whh_l),
        conv_mat=jnp.stack(cm_l),
        conv_bias=jnp.stack(cb_l),
        lin_w=jnp.stack(lw_l),
        lin_b=jnp.stack(lb_l),
    )


# ----------------------------------------------------------------------------
# Parameter init (deterministic, synthetic)
# ----------------------------------------------------------------------------
def init_params(key):
    params = {}
    params['emb_table'] = 0.02 * jax.random.normal(
        jax.random.fold_in(key, 999), (VOCAB, D_IN), jnp.float32)
    for ti, task in enumerate('abcde'):
        k = jax.random.fold_in(key, ti)
        ks = jax.random.split(k, 16)
        s = 0.1
        n_out = N_CLASSES[task]
        params[task] = dict(
            wih_f=s * jax.random.normal(ks[0], (4 * HIDDEN, D_IN), jnp.float32),
            whh_f=s * jax.random.normal(ks[1], (4 * HIDDEN, HIDDEN), jnp.float32),
            bih_f=s * jax.random.normal(ks[2], (4 * HIDDEN,), jnp.float32),
            bhh_f=s * jax.random.normal(ks[3], (4 * HIDDEN,), jnp.float32),
            wih_b=s * jax.random.normal(ks[4], (4 * HIDDEN, D_IN), jnp.float32),
            whh_b=s * jax.random.normal(ks[5], (4 * HIDDEN, HIDDEN), jnp.float32),
            bih_b=s * jax.random.normal(ks[6], (4 * HIDDEN,), jnp.float32),
            bhh_b=s * jax.random.normal(ks[7], (4 * HIDDEN,), jnp.float32),
            conv_w=s * jax.random.normal(ks[8], (1, 2, 3), jnp.float32),
            conv_b=s * jax.random.normal(ks[9], (1,), jnp.float32),
            bn_gamma=1.0 + 0.1 * jax.random.normal(ks[10], (1,), jnp.float32),
            bn_beta=0.1 * jax.random.normal(ks[11], (1,), jnp.float32),
            bn_mean=0.05 * jax.random.normal(ks[12], (1,), jnp.float32),
            bn_var=1.0 + 0.1 * jax.random.uniform(ks[13], (1,), jnp.float32),
            lin_w=s * jax.random.normal(ks[14], (n_out, HIDDEN), jnp.float32),
            lin_b=s * jax.random.normal(ks[15], (n_out,), jnp.float32),
        )
    return params


# ----------------------------------------------------------------------------
# Full forward
# ----------------------------------------------------------------------------
@jax.jit
def mtl_forward(inputs, lens, mask, emb_table, head_params):
    # TODO(synk): pretrained MARBERT transformer encoder (AutoModel) replaced
    # by a deterministic embedding lookup; attention mask / lens are not used.
    del lens, mask
    embs = emb_table[inputs]                               # [B, S, 768]
    logits = mtl_heads_pallas(embs, head_params)           # [5, B, 128]
    return tuple(logits[i, :, :N_CLASSES[t]] for i, t in enumerate('abcde'))


# ----------------------------------------------------------------------------
# Pure-JAX reference (mirrors the PyTorch forward in eval mode)
# ----------------------------------------------------------------------------
def _ref_head(embs_bsd, tp):
    B, S, D = embs_bsd.shape
    H = HIDDEN

    def run_dir(wih, whh, bih, bhh, reverse):
        h = jnp.zeros((B, H), jnp.float32)
        c = jnp.zeros((B, H), jnp.float32)
        order = range(S - 1, -1, -1) if reverse else range(S)
        for t in order:
            x = embs_bsd[:, t, :]
            gates = x @ wih.T + h @ whh.T + bih + bhh
            i = jax.nn.sigmoid(gates[:, 0:H])
            f = jax.nn.sigmoid(gates[:, H:2 * H])
            g = jnp.tanh(gates[:, 2 * H:3 * H])
            o = jax.nn.sigmoid(gates[:, 3 * H:4 * H])
            c = f * c + i * g
            h = o * jnp.tanh(c)
        return h

    h_f = run_dir(tp['wih_f'], tp['whh_f'], tp['bih_f'], tp['bhh_f'], False)
    h_b = run_dir(tp['wih_b'], tp['whh_b'], tp['bih_b'], tp['bhh_b'], True)
    x = jnp.stack([h_f, h_b], axis=1)                      # [B, 2, H]
    xp = jnp.pad(x, ((0, 0), (0, 0), (1, 1)))
    conv = tp['conv_b'][0] + sum(
        tp['conv_w'][0, ci, k] * xp[:, ci, k:k + H]
        for ci in range(2) for k in range(3))              # [B, H]
    bn = (tp['bn_gamma'][0] * (conv - tp['bn_mean'][0]) /
          jnp.sqrt(tp['bn_var'][0] + BN_EPS) + tp['bn_beta'][0])
    act = jnp.maximum(bn, 0.0)
    return act @ tp['lin_w'].T + tp['lin_b']


def mtl_forward_ref(inputs, lens, mask, params):
    del lens, mask
    embs = params['emb_table'][inputs]
    return tuple(_ref_head(embs, params[t]) for t in 'abcde')


# ----------------------------------------------------------------------------
if __name__ == "__main__":
    key = jax.random.PRNGKey(0)
    B, S = 2, 8
    params = init_params(key)
    head_params = prepare_head_params(params)

    inputs = jax.random.randint(jax.random.fold_in(key, 1), (B, S), 0, VOCAB,
                                dtype=jnp.int32)
    lens = jnp.array([S, S - 2], dtype=jnp.int32)
    mask = jnp.ones((B, S), dtype=jnp.int32)

    outs = mtl_forward(inputs, lens, mask, params['emb_table'], head_params)
    outs = jax.block_until_ready(outs)

    refs = mtl_forward_ref(inputs, lens, mask, params)
    for t, o, r in zip('abcde', outs, refs):
        assert o.shape == (B, N_CLASSES[t]), (t, o.shape)
        if not jnp.allclose(o, r, rtol=2e-2, atol=2e-2):
            raise AssertionError(
                f"task {t}: max abs diff {jnp.max(jnp.abs(o - r))}")

    print("KERNEL_OK")
</pallas_src>

<mosaic_0001>
module attributes {stable_mosaic.version = 11 : i64} {
  func.func @_mtl_heads_kernel(%arg0: i32, %arg1: memref<16x768xbf16, #tpu.memory_space<vmem>>, %arg2: memref<1x768x256xbf16, #tpu.memory_space<vmem>>, %arg3: memref<1x1x256xf32, #tpu.memory_space<vmem>>, %arg4: memref<1x64x256xf32, #tpu.memory_space<vmem>>, %arg5: memref<1x64x128xf32, #tpu.memory_space<vmem>>, %arg6: memref<1x1x128xf32, #tpu.memory_space<vmem>>, %arg7: memref<1x128x128xf32, #tpu.memory_space<vmem>>, %arg8: memref<1x1x128xf32, #tpu.memory_space<vmem>>, %arg9: memref<1x2x128xf32, #tpu.memory_space<vmem>>, %arg10: memref<16x256xf32, #tpu.memory_space<vmem>>) attributes {dimension_semantics = [#tpu.dimension_semantics<parallel>], iteration_bounds = array<i64: 5>, scalar_prefetch = 0 : i64, scratch_operands = 1 : i64, tpu.core_type = #tpu.core_type<tc>, window_params = [{pipeline_mode = #tpu.pipeline_mode<synchronous>, transform_indices = @transform_0, window_bounds = array<i64: 16, 768>}, {transform_indices = @transform_1, window_bounds = array<i64: 1, 768, 256>}, {transform_indices = @transform_2, window_bounds = array<i64: 1, 1, 256>}, {transform_indices = @transform_3, window_bounds = array<i64: 1, 64, 256>}, {transform_indices = @transform_4, window_bounds = array<i64: 1, 64, 128>}, {transform_indices = @transform_5, window_bounds = array<i64: 1, 1, 128>}, {transform_indices = @transform_6, window_bounds = array<i64: 1, 128, 128>}, {transform_indices = @transform_7, window_bounds = array<i64: 1, 1, 128>}, {transform_indices = @transform_8, window_bounds = array<i64: 1, 2, 128>}]} {
    %c0 = arith.constant 0 : index
    %c0_0 = arith.constant 0 : index
    %0 = vector.load %arg1[%c0, %c0_0] : memref<16x768xbf16, #tpu.memory_space<vmem>>, vector<16x768xbf16>
    %c0_1 = arith.constant 0 : index
    %c0_2 = arith.constant 0 : index
    %c0_3 = arith.constant 0 : index
    %1 = vector.load %arg2[%c0_1, %c0_2, %c0_3] : memref<1x768x256xbf16, #tpu.memory_space<vmem>>, vector<1x768x256xbf16>
    %2 = vector.shape_cast %1 : vector<1x768x256xbf16> to vector<768x256xbf16>
    %cst = arith.constant dense<0.000000e+00> : vector<16x256xf32>
    %3 = tpu.matmul %0, %2, %cst {dimension_numbers = #tpu.dot_dimension_numbers<[1], [0], [0], [1], [0, 0, 1, 1], [], []>} : vector<16x768xbf16>, vector<768x256xbf16>, vector<16x256xf32> -> vector<16x256xf32>
    %c0_4 = arith.constant 0 : index
    %c0_5 = arith.constant 0 : index
    %c0_6 = arith.constant 0 : index
    %4 = vector.load %arg3[%c0_4, %c0_5, %c0_6] : memref<1x1x256xf32, #tpu.memory_space<vmem>>, vector<1x1x256xf32>
    %5 = vector.shape_cast %4 : vector<1x1x256xf32> to vector<1x256xf32>
    %6 = vector.broadcast %5 : vector<1x256xf32> to vector<16x256xf32>
    %7 = arith.addf %3, %6 : vector<16x256xf32>
    %c0_7 = arith.constant 0 : index
    %c0_8 = arith.constant 0 : index
    %8 = vector.load %arg10[%c0_7, %c0_8] : memref<16x256xf32, #tpu.memory_space<vmem>>, vector<16x256xf32>
    tpu.vector_store %arg10[%c0_7, %c0_8], %7 {strides = array<i32>} : memref<16x256xf32, #tpu.memory_space<vmem>>, vector<16x256xf32>,
    %9 = tpu.iota {dimensions = array<i32: 1>} : vector<2x256xi32>
    %c64_i32 = arith.constant 64 : i32
    %c0_i32 = arith.constant 0 : i32
    %10 = arith.cmpi eq, %c64_i32, %c0_i32 : i32
    %c1_i32 = arith.constant 1 : i32
    %11 = arith.select %10, %c1_i32, %c64_i32 : i32
    %12 = vector.broadcast %11 : i32 to vector<2x256xi32>
    %13 = arith.remsi %9, %12 : vector<2x256xi32>
    %c0_i32_9 = arith.constant 0 : i32
    %14 = vector.broadcast %c0_i32_9 : i32 to vector<2x256xi32>
    %15 = arith.cmpi ne, %13, %14 : vector<2x256xi32>
    %c0_i32_10 = arith.constant 0 : i32
    %16 = vector.broadcast %c0_i32_10 : i32 to vector<2x256xi32>
    %17 = arith.cmpi slt, %13, %16 : vector<2x256xi32>
    %c0_i32_11 = arith.constant 0 : i32
    %18 = arith.cmpi slt, %11, %c0_i32_11 : i32
    %19 = vector.broadcast %18 : i1 to vector<2x256xi1>
    %20 = vector.broadcast %19 : vector<2x256xi1> to vector<2x256xi1>
    %21 = arith.xori %17, %20 : vector<2x256xi1>
    %22 = arith.andi %21, %15 : vector<2x256xi1>
    %23 = vector.broadcast %11 : i32 to vector<2x256xi32>
    %24 = arith.addi %13, %23 : vector<2x256xi32>
    %25 = arith.select %22, %24, %13 : vector<2x256xi1>, vector<2x256xi32>
    %c32_i32 = arith.constant 32 : i32
    %26 = vector.broadcast %c32_i32 : i32 to vector<2x256xi32>
    %27 = arith.cmpi slt, %25, %26 : vector<2x256xi32>
    %c128_i32 = arith.constant 128 : i32
    %28 = vector.broadcast %c128_i32 : i32 to vector<2x256xi32>
    %29 = arith.cmpi sge, %9, %28 : vector<2x256xi32>
    %c192_i32 = arith.constant 192 : i32
    %30 = vector.broadcast %c192_i32 : i32 to vector<2x256xi32>
    %31 = arith.cmpi slt, %9, %30 : vector<2x256xi32>
    %32 = arith.andi %29, %31 : vector<2x256xi1>
    %c0_12 = arith.constant 0 : index
    %c0_13 = arith.constant 0 : index
    %c0_14 = arith.constant 0 : index
    %33 = vector.load %arg4[%c0_12, %c0_13, %c0_14] : memref<1x64x256xf32, #tpu.memory_space<vmem>>, vector<1x64x256xf32>
    %34 = vector.shape_cast %33 : vector<1x64x256xf32> to vector<64x256xf32>
    %cst_15 = arith.constant 0.000000e+00 : f32
    %35 = vector.broadcast %cst_15 : f32 to vector<2x64xf32>
    %cst_16 = arith.constant 0.000000e+00 : f32
    %36 = vector.broadcast %cst_16 : f32 to vector<2x64xf32>
    %c0_i32_17 = arith.constant 0 : i32
    %c2_i32 = arith.constant 2 : i32
    %37 = arith.muli %c2_i32, %c0_i32_17 : i32
    %38 = arith.index_cast %37 : i32 to index
    %c0_18 = arith.constant 0 : index
    %39 = vector.load %arg10[%38, %c0_18] : memref<16x256xf32, #tpu.memory_space<vmem>>, vector<2x256xf32>
    %c7_i32 = arith.constant 7 : i32
    %40 = arith.subi %c7_i32, %c0_i32_17 : i32
    %c2_i32_19 = arith.constant 2 : i32
    %41 = arith.muli %c2_i32_19, %40 : i32
    %42 = arith.index_cast %41 : i32 to index
    %c0_20 = arith.constant 0 : index
    %43 = vector.load %arg10[%42, %c0_20] : memref<16x256xf32, #tpu.memory_space<vmem>>, vector<2x256xf32>
    %44 = arith.select %27, %39, %43 : vector<2x256xi1>, vector<2x256xf32>
    %cst_21 = arith.constant dense<0.000000e+00> : vector<2x256xf32>
    %45 = tpu.matmul %35, %34, %cst_21 {dimension_numbers = #tpu.dot_dimension_numbers<[1], [0], [0], [1], [0, 0, 1, 1], [], []>} : vector<2x64xf32>, vector<64x256xf32>, vector<2x256xf32> -> vector<2x256xf32>
    %46 = arith.addf %44, %45 : vector<2x256xf32>
    %47 = math.tanh %46 : vector<2x256xf32>
    %48 = arith.negf %46 : vector<2x256xf32>
    %49 = math.exp %48 : vector<2x256xf32>
    %cst_22 = arith.constant 1.000000e+00 : f32
    %50 = vector.broadcast %cst_22 : f32 to vector<2x256xf32>
    %51 = arith.addf %50, %49 : vector<2x256xf32>
    %52 = arith.divf %50, %51 : vector<2x256xf32>
    %53 = arith.select %32, %47, %52 : vector<2x256xi1>, vector<2x256xf32>
    %54 = vector.extract_strided_slice %53 {offsets = [0, 0], sizes = [2, 64], strides = [1, 1]} : vector<2x256xf32> to vector<2x64xf32>
    %55 = vector.extract_strided_slice %53 {offsets = [0, 64], sizes = [2, 64], strides = [1, 1]} : vector<2x256xf32> to vector<2x64xf32>
    %56 = vector.extract_strided_slice %53 {offsets = [0, 128], sizes = [2, 64], strides = [1, 1]} : vector<2x256xf32> to vector<2x64xf32>
    %57 = vector.extract_strided_slice %53 {offsets = [0, 192], sizes = [2, 64], strides = [1, 1]} : vector<2x256xf32> to vector<2x64xf32>
    %58 = arith.mulf %55, %36 : vector<2x64xf32>
    %59 = arith.mulf %54, %56 : vector<2x64xf32>
    %60 = arith.addf %58, %59 : vector<2x64xf32>
    %61 = math.tanh %60 : vector<2x64xf32>
    %62 = arith.mulf %57, %61 : vector<2x64xf32>
    %c1_i32_23 = arith.constant 1 : i32
    %c2_i32_24 = arith.constant 2 : i32
    %63 = arith.muli %c2_i32_24, %c1_i32_23 : i32
    %64 = arith.index_cast %63 : i32 to index
    %c0_25 = arith.constant 0 : index
    %65 = vector.load %arg10[%64, %c0_25] : memref<16x256xf32, #tpu.memory_space<vmem>>, vector<2x256xf32>
    %c7_i32_26 = arith.constant 7 : i32
    %66 = arith.subi %c7_i32_26, %c1_i32_23 : i32
    %c2_i32_27 = arith.constant 2 : i32
    %67 = arith.muli %c2_i32_27, %66 : i32
    %68 = arith.index_cast %67 : i32 to index
    %c0_28 = arith.constant 0 : index
    %69 = vector.load %arg10[%68, %c0_28] : memref<16x256xf32, #tpu.memory_space<vmem>>, vector<2x256xf32>
    %70 = arith.select %27, %65, %69 : vector<2x256xi1>, vector<2x256xf32>
    %cst_29 = arith.constant dense<0.000000e+00> : vector<2x256xf32>
    %71 = tpu.matmul %62, %34, %cst_29 {dimension_numbers = #tpu.dot_dimension_numbers<[1], [0], [0], [1], [0, 0, 1, 1], [], []>} : vector<2x64xf32>, vector<64x256xf32>, vector<2x256xf32> -> vector<2x256xf32>
    %72 = arith.addf %70, %71 : vector<2x256xf32>
    %73 = math.tanh %72 : vector<2x256xf32>
    %74 = arith.negf %72 : vector<2x256xf32>
    %75 = math.exp %74 : vector<2x256xf32>
    %cst_30 = arith.constant 1.000000e+00 : f32
    %76 = vector.broadcast %cst_30 : f32 to vector<2x256xf32>
    %77 = arith.addf %76, %75 : vector<2x256xf32>
    %78 = arith.divf %76, %77 : vector<2x256xf32>
    %79 = arith.select %32, %73, %78 : vector<2x256xi1>, vector<2x256xf32>
    %80 = vector.extract_strided_slice %79 {offsets = [0, 0], sizes = [2, 64], strides = [1, 1]} : vector<2x256xf32> to vector<2x64xf32>
    %81 = vector.extract_strided_slice %79 {offsets = [0, 64], sizes = [2, 64], strides = [1, 1]} : vector<2x256xf32> to vector<2x64xf32>
    %82 = vector.extract_strided_slice %79 {offsets = [0, 128], sizes = [2, 64], strides = [1, 1]} : vector<2x256xf32> to vector<2x64xf32>
    %83 = vector.extract_strided_slice %79 {offsets = [0, 192], sizes = [2, 64], strides = [1, 1]} : vector<2x256xf32> to vector<2x64xf32>
    %84 = arith.mulf %81, %60 : vector<2x64xf32>
    %85 = arith.mulf %80, %82 : vector<2x64xf32>
    %86 = arith.addf %84, %85 : vector<2x64xf32>
    %87 = math.tanh %86 : vector<2x64xf32>
    %88 = arith.mulf %83, %87 : vector<2x64xf32>
    %c2_i32_31 = arith.constant 2 : i32
    %c2_i32_32 = arith.constant 2 : i32
    %89 = arith.muli %c2_i32_32, %c2_i32_31 : i32
    %90 = arith.index_cast %89 : i32 to index
    %c0_33 = arith.constant 0 : index
    %91 = vector.load %arg10[%90, %c0_33] : memref<16x256xf32, #tpu.memory_space<vmem>>, vector<2x256xf32>
    %c7_i32_34 = arith.constant 7 : i32
    %92 = arith.subi %c7_i32_34, %c2_i32_31 : i32
    %c2_i32_35 = arith.constant 2 : i32
    %93 = arith.muli %c2_i32_35, %92 : i32
    %94 = arith.index_cast %93 : i32 to index
    %c0_36 = arith.constant 0 : index
    %95 = vector.load %arg10[%94, %c0_36] : memref<16x256xf32, #tpu.memory_space<vmem>>, vector<2x256xf32>
    %96 = arith.select %27, %91, %95 : vector<2x256xi1>, vector<2x256xf32>
    %cst_37 = arith.constant dense<0.000000e+00> : vector<2x256xf32>
    %97 = tpu.matmul %88, %34, %cst_37 {dimension_numbers = #tpu.dot_dimension_numbers<[1], [0], [0], [1], [0, 0, 1, 1], [], []>} : vector<2x64xf32>, vector<64x256xf32>, vector<2x256xf32> -> vector<2x256xf32>
    %98 = arith.addf %96, %97 : vector<2x256xf32>
    %99 = math.tanh %98 : vector<2x256xf32>
    %100 = arith.negf %98 : vector<2x256xf32>
    %101 = math.exp %100 : vector<2x256xf32>
    %cst_38 = arith.constant 1.000000e+00 : f32
    %102 = vector.broadcast %cst_38 : f32 to vector<2x256xf32>
    %103 = arith.addf %102, %101 : vector<2x256xf32>
    %104 = arith.divf %102, %103 : vector<2x256xf32>
    %105 = arith.select %32, %99, %104 : vector<2x256xi1>, vector<2x256xf32>
    %106 = vector.extract_strided_slice %105 {offsets = [0, 0], sizes = [2, 64], strides = [1, 1]} : vector<2x256xf32> to vector<2x64xf32>
    %107 = vector.extract_strided_slice %105 {offsets = [0, 64], sizes = [2, 64], strides = [1, 1]} : vector<2x256xf32> to vector<2x64xf32>
    %108 = vector.extract_strided_slice %105 {offsets = [0, 128], sizes = [2, 64], strides = [1, 1]} : vector<2x256xf32> to vector<2x64xf32>
    %109 = vector.extract_strided_slice %105 {offsets = [0, 192], sizes = [2, 64], strides = [1, 1]} : vector<2x256xf32> to vector<2x64xf32>
    %110 = arith.mulf %107, %86 : vector<2x64xf32>
    %111 = arith.mulf %106, %108 : vector<2x64xf32>
    %112 = arith.addf %110, %111 : vector<2x64xf32>
    %113 = math.tanh %112 : vector<2x64xf32>
    %114 = arith.mulf %109, %113 : vector<2x64xf32>
    %c3_i32 = arith.constant 3 : i32
    %c2_i32_39 = arith.constant 2 : i32
    %115 = arith.muli %c2_i32_39, %c3_i32 : i32
    %116 = arith.index_cast %115 : i32 to index
    %c0_40 = arith.constant 0 : index
    %117 = vector.load %arg10[%116, %c0_40] : memref<16x256xf32, #tpu.memory_space<vmem>>, vector<2x256xf32>
    %c7_i32_41 = arith.constant 7 : i32
    %118 = arith.subi %c7_i32_41, %c3_i32 : i32
    %c2_i32_42 = arith.constant 2 : i32
    %119 = arith.muli %c2_i32_42, %118 : i32
    %120 = arith.index_cast %119 : i32 to index
    %c0_43 = arith.constant 0 : index
    %121 = vector.load %arg10[%120, %c0_43] : memref<16x256xf32, #tpu.memory_space<vmem>>, vector<2x256xf32>
    %122 = arith.select %27, %117, %121 : vector<2x256xi1>, vector<2x256xf32>
    %cst_44 = arith.constant dense<0.000000e+00> : vector<2x256xf32>
    %123 = tpu.matmul %114, %34, %cst_44 {dimension_numbers = #tpu.dot_dimension_numbers<[1], [0], [0], [1], [0, 0, 1, 1], [], []>} : vector<2x64xf32>, vector<64x256xf32>, vector<2x256xf32> -> vector<2x256xf32>
    %124 = arith.addf %122, %123 : vector<2x256xf32>
    %125 = math.tanh %124 : vector<2x256xf32>
    %126 = arith.negf %124 : vector<2x256xf32>
    %127 = math.exp %126 : vector<2x256xf32>
    %cst_45 = arith.constant 1.000000e+00 : f32
    %128 = vector.broadcast %cst_45 : f32 to vector<2x256xf32>
    %129 = arith.addf %128, %127 : vector<2x256xf32>
    %130 = arith.divf %128, %129 : vector<2x256xf32>
    %131 = arith.select %32, %125, %130 : vector<2x256xi1>, vector<2x256xf32>
    %132 = vector.extract_strided_slice %131 {offsets = [0, 0], sizes = [2, 64], strides = [1, 1]} : vector<2x256xf32> to vector<2x64xf32>
    %133 = vector.extract_strided_slice %131 {offsets = [0, 64], sizes = [2, 64], strides = [1, 1]} : vector<2x256xf32> to vector<2x64xf32>
    %134 = vector.extract_strided_slice %131 {offsets = [0, 128], sizes = [2, 64], strides = [1, 1]} : vector<2x256xf32> to vector<2x64xf32>
    %135 = vector.extract_strided_slice %131 {offsets = [0, 192], sizes = [2, 64], strides = [1, 1]} : vector<2x256xf32> to vector<2x64xf32>
    %136 = arith.mulf %133, %112 : vector<2x64xf32>
    %137 = arith.mulf %132, %134 : vector<2x64xf32>
    %138 = arith.addf %136, %137 : vector<2x64xf32>
    %139 = math.tanh %138 : vector<2x64xf32>
    %140 = arith.mulf %135, %139 : vector<2x64xf32>
    %c4_i32 = arith.constant 4 : i32
    %c2_i32_46 = arith.constant 2 : i32
    %141 = arith.muli %c2_i32_46, %c4_i32 : i32
    %142 = arith.index_cast %141 : i32 to index
    %c0_47 = arith.constant 0 : index
    %143 = vector.load %arg10[%142, %c0_47] : memref<16x256xf32, #tpu.memory_space<vmem>>, vector<2x256xf32>
    %c7_i32_48 = arith.constant 7 : i32
    %144 = arith.subi %c7_i32_48, %c4_i32 : i32
    %c2_i32_49 = arith.constant 2 : i32
    %145 = arith.muli %c2_i32_49, %144 : i32
    %146 = arith.index_cast %145 : i32 to index
    %c0_50 = arith.constant 0 : index
    %147 = vector.load %arg10[%146, %c0_50] : memref<16x256xf32, #tpu.memory_space<vmem>>, vector<2x256xf32>
    %148 = arith.select %27, %143, %147 : vector<2x256xi1>, vector<2x256xf32>
    %cst_51 = arith.constant dense<0.000000e+00> : vector<2x256xf32>
    %149 = tpu.matmul %140, %34, %cst_51 {dimension_numbers = #tpu.dot_dimension_numbers<[1], [0], [0], [1], [0, 0, 1, 1], [], []>} : vector<2x64xf32>, vector<64x256xf32>, vector<2x256xf32> -> vector<2x256xf32>
    %150 = arith.addf %148, %149 : vector<2x256xf32>
    %151 = math.tanh %150 : vector<2x256xf32>
    %152 = arith.negf %150 : vector<2x256xf32>
    %153 = math.exp %152 : vector<2x256xf32>
    %cst_52 = arith.constant 1.000000e+00 : f32
    %154 = vector.broadcast %cst_52 : f32 to vector<2x256xf32>
    %155 = arith.addf %154, %153 : vector<2x256xf32>
    %156 = arith.divf %154, %155 : vector<2x256xf32>
    %157 = arith.select %32, %151, %156 : vector<2x256xi1>, vector<2x256xf32>
    %158 = vector.extract_strided_slice %157 {offsets = [0, 0], sizes = [2, 64], strides = [1, 1]} : vector<2x256xf32> to vector<2x64xf32>
    %159 = vector.extract_strided_slice %157 {offsets = [0, 64], sizes = [2, 64], strides = [1, 1]} : vector<2x256xf32> to vector<2x64xf32>
    %160 = vector.extract_strided_slice %157 {offsets = [0, 128], sizes = [2, 64], strides = [1, 1]} : vector<2x256xf32> to vector<2x64xf32>
    %161 = vector.extract_strided_slice %157 {offsets = [0, 192], sizes = [2, 64], strides = [1, 1]} : vector<2x256xf32> to vector<2x64xf32>
    %162 = arith.mulf %159, %138 : vector<2x64xf32>
    %163 = arith.mulf %158, %160 : vector<2x64xf32>
    %164 = arith.addf %162, %163 : vector<2x64xf32>
    %165 = math.tanh %164 : vector<2x64xf32>
    %166 = arith.mulf %161, %165 : vector<2x64xf32>
    %c5_i32 = arith.constant 5 : i32
    %c2_i32_53 = arith.constant 2 : i32
    %167 = arith.muli %c2_i32_53, %c5_i32 : i32
    %168 = arith.index_cast %167 : i32 to index
    %c0_54 = arith.constant 0 : index
    %169 = vector.load %arg10[%168, %c0_54] : memref<16x256xf32, #tpu.memory_space<vmem>>, vector<2x256xf32>
    %c7_i32_55 = arith.constant 7 : i32
    %170 = arith.subi %c7_i32_55, %c5_i32 : i32
    %c2_i32_56 = arith.constant 2 : i32
    %171 = arith.muli %c2_i32_56, %170 : i32
    %172 = arith.index_cast %171 : i32 to index
    %c0_57 = arith.constant 0 : index
    %173 = vector.load %arg10[%172, %c0_57] : memref<16x256xf32, #tpu.memory_space<vmem>>, vector<2x256xf32>
    %174 = arith.select %27, %169, %173 : vector<2x256xi1>, vector<2x256xf32>
    %cst_58 = arith.constant dense<0.000000e+00> : vector<2x256xf32>
    %175 = tpu.matmul %166, %34, %cst_58 {dimension_numbers = #tpu.dot_dimension_numbers<[1], [0], [0], [1], [0, 0, 1, 1], [], []>} : vector<2x64xf32>, vector<64x256xf32>, vector<2x256xf32> -> vector<2x256xf32>
    %176 = arith.addf %174, %175 : vector<2x256xf32>
    %177 = math.tanh %176 : vector<2x256xf32>
    %178 = arith.negf %176 : vector<2x256xf32>
    %179 = math.exp %178 : vector<2x256xf32>
    %cst_59 = arith.constant 1.000000e+00 : f32
    %180 = vector.broadcast %cst_59 : f32 to vector<2x256xf32>
    %181 = arith.addf %180, %179 : vector<2x256xf32>
    %182 = arith.divf %180, %181 : vector<2x256xf32>
    %183 = arith.select %32, %177, %182 : vector<2x256xi1>, vector<2x256xf32>
    %184 = vector.extract_strided_slice %183 {offsets = [0, 0], sizes = [2, 64], strides = [1, 1]} : vector<2x256xf32> to vector<2x64xf32>
    %185 = vector.extract_strided_slice %183 {offsets = [0, 64], sizes = [2, 64], strides = [1, 1]} : vector<2x256xf32> to vector<2x64xf32>
    %186 = vector.extract_strided_slice %183 {offsets = [0, 128], sizes = [2, 64], strides = [1, 1]} : vector<2x256xf32> to vector<2x64xf32>
    %187 = vector.extract_strided_slice %183 {offsets = [0, 192], sizes = [2, 64], strides = [1, 1]} : vector<2x256xf32> to vector<2x64xf32>
    %188 = arith.mulf %185, %164 : vector<2x64xf32>
    %189 = arith.mulf %184, %186 : vector<2x64xf32>
    %190 = arith.addf %188, %189 : vector<2x64xf32>
    %191 = math.tanh %190 : vector<2x64xf32>
    %192 = arith.mulf %187, %191 : vector<2x64xf32>
    %c6_i32 = arith.constant 6 : i32
    %c2_i32_60 = arith.constant 2 : i32
    %193 = arith.muli %c2_i32_60, %c6_i32 : i32
    %194 = arith.index_cast %193 : i32 to index
    %c0_61 = arith.constant 0 : index
    %195 = vector.load %arg10[%194, %c0_61] : memref<16x256xf32, #tpu.memory_space<vmem>>, vector<2x256xf32>
    %c7_i32_62 = arith.constant 7 : i32
    %196 = arith.subi %c7_i32_62, %c6_i32 : i32
    %c2_i32_63 = arith.constant 2 : i32
    %197 = arith.muli %c2_i32_63, %196 : i32
    %198 = arith.index_cast %197 : i32 to index
    %c0_64 = arith.constant 0 : index
    %199 = vector.load %arg10[%198, %c0_64] : memref<16x256xf32, #tpu.memory_space<vmem>>, vector<2x256xf32>
    %200 = arith.select %27, %195, %199 : vector<2x256xi1>, vector<2x256xf32>
    %cst_65 = arith.constant dense<0.000000e+00> : vector<2x256xf32>
    %201 = tpu.matmul %192, %34, %cst_65 {dimension_numbers = #tpu.dot_dimension_numbers<[1], [0], [0], [1], [0, 0, 1, 1], [], []>} : vector<2x64xf32>, vector<64x256xf32>, vector<2x256xf32> -> vector<2x256xf32>
    %202 = arith.addf %200, %201 : vector<2x256xf32>
    %203 = math.tanh %202 : vector<2x256xf32>
    %204 = arith.negf %202 : vector<2x256xf32>
    %205 = math.exp %204 : vector<2x256xf32>
    %cst_66 = arith.constant 1.000000e+00 : f32
    %206 = vector.broadcast %cst_66 : f32 to vector<2x256xf32>
    %207 = arith.addf %206, %205 : vector<2x256xf32>
    %208 = arith.divf %206, %207 : vector<2x256xf32>
    %209 = arith.select %32, %203, %208 : vector<2x256xi1>, vector<2x256xf32>
    %210 = vector.extract_strided_slice %209 {offsets = [0, 0], sizes = [2, 64], strides = [1, 1]} : vector<2x256xf32> to vector<2x64xf32>
    %211 = vector.extract_strided_slice %209 {offsets = [0, 64], sizes = [2, 64], strides = [1, 1]} : vector<2x256xf32> to vector<2x64xf32>
    %212 = vector.extract_strided_slice %209 {offsets = [0, 128], sizes = [2, 64], strides = [1, 1]} : vector<2x256xf32> to vector<2x64xf32>
    %213 = vector.extract_strided_slice %209 {offsets = [0, 192], sizes = [2, 64], strides = [1, 1]} : vector<2x256xf32> to vector<2x64xf32>
    %214 = arith.mulf %211, %190 : vector<2x64xf32>
    %215 = arith.mulf %210, %212 : vector<2x64xf32>
    %216 = arith.addf %214, %215 : vector<2x64xf32>
    %217 = math.tanh %216 : vector<2x64xf32>
    %218 = arith.mulf %213, %217 : vector<2x64xf32>
    %c7_i32_67 = arith.constant 7 : i32
    %c2_i32_68 = arith.constant 2 : i32
    %219 = arith.muli %c2_i32_68, %c7_i32_67 : i32
    %220 = arith.index_cast %219 : i32 to index
    %c0_69 = arith.constant 0 : index
    %221 = vector.load %arg10[%220, %c0_69] : memref<16x256xf32, #tpu.memory_space<vmem>>, vector<2x256xf32>
    %c7_i32_70 = arith.constant 7 : i32
    %222 = arith.subi %c7_i32_70, %c7_i32_67 : i32
    %c2_i32_71 = arith.constant 2 : i32
    %223 = arith.muli %c2_i32_71, %222 : i32
    %224 = arith.index_cast %223 : i32 to index
    %c0_72 = arith.constant 0 : index
    %225 = vector.load %arg10[%224, %c0_72] : memref<16x256xf32, #tpu.memory_space<vmem>>, vector<2x256xf32>
    %226 = arith.select %27, %221, %225 : vector<2x256xi1>, vector<2x256xf32>
    %cst_73 = arith.constant dense<0.000000e+00> : vector<2x256xf32>
    %227 = tpu.matmul %218, %34, %cst_73 {dimension_numbers = #tpu.dot_dimension_numbers<[1], [0], [0], [1], [0, 0, 1, 1], [], []>} : vector<2x64xf32>, vector<64x256xf32>, vector<2x256xf32> -> vector<2x256xf32>
    %228 = arith.addf %226, %227 : vector<2x256xf32>
    %229 = math.tanh %228 : vector<2x256xf32>
    %230 = arith.negf %228 : vector<2x256xf32>
    %231 = math.exp %230 : vector<2x256xf32>
    %cst_74 = arith.constant 1.000000e+00 : f32
    %232 = vector.broadcast %cst_74 : f32 to vector<2x256xf32>
    %233 = arith.addf %232, %231 : vector<2x256xf32>
    %234 = arith.divf %232, %233 : vector<2x256xf32>
    %235 = arith.select %32, %229, %234 : vector<2x256xi1>, vector<2x256xf32>
    %236 = vector.extract_strided_slice %235 {offsets = [0, 0], sizes = [2, 64], strides = [1, 1]} : vector<2x256xf32> to vector<2x64xf32>
    %237 = vector.extract_strided_slice %235 {offsets = [0, 64], sizes = [2, 64], strides = [1, 1]} : vector<2x256xf32> to vector<2x64xf32>
    %238 = vector.extract_strided_slice %235 {offsets = [0, 128], sizes = [2, 64], strides = [1, 1]} : vector<2x256xf32> to vector<2x64xf32>
    %239 = vector.extract_strided_slice %235 {offsets = [0, 192], sizes = [2, 64], strides = [1, 1]} : vector<2x256xf32> to vector<2x64xf32>
    %240 = arith.mulf %237, %216 : vector<2x64xf32>
    %241 = arith.mulf %236, %238 : vector<2x64xf32>
    %242 = arith.addf %240, %241 : vector<2x64xf32>
    %243 = math.tanh %242 : vector<2x64xf32>
    %244 = arith.mulf %239, %243 : vector<2x64xf32>
    %c8_i32 = arith.constant 8 : i32
    %c0_75 = arith.constant 0 : index
    %c0_76 = arith.constant 0 : index
    %c0_77 = arith.constant 0 : index
    %245 = vector.load %arg5[%c0_75, %c0_76, %c0_77] : memref<1x64x128xf32, #tpu.memory_space<vmem>>, vector<1x64x128xf32>
    %246 = vector.shape_cast %245 : vector<1x64x128xf32> to vector<64x128xf32>
    %cst_78 = arith.constant dense<0.000000e+00> : vector<2x128xf32>
    %247 = tpu.matmul %244, %246, %cst_78 {dimension_numbers = #tpu.dot_dimension_numbers<[1], [0], [0], [1], [0, 0, 1, 1], [], []>} : vector<2x64xf32>, vector<64x128xf32>, vector<2x128xf32> -> vector<2x128xf32>
    %c0_79 = arith.constant 0 : index
    %c0_80 = arith.constant 0 : index
    %c0_81 = arith.constant 0 : index
    %248 = vector.load %arg6[%c0_79, %c0_80, %c0_81] : memref<1x1x128xf32, #tpu.memory_space<vmem>>, vector<1x1x128xf32>
    %249 = vector.shape_cast %248 : vector<1x1x128xf32> to vector<1x128xf32>
    %250 = vector.broadcast %249 : vector<1x128xf32> to vector<2x128xf32>
    %251 = arith.addf %247, %250 : vector<2x128xf32>
    %cst_82 = arith.constant 0.000000e+00 : f32
    %252 = vector.broadcast %cst_82 : f32 to vector<2x128xf32>
    %253 = arith.maximumf %251, %252 : vector<2x128xf32>
    %c0_83 = arith.constant 0 : index
    %c0_84 = arith.constant 0 : index
    %c0_85 = arith.constant 0 : index
    %254 = vector.load %arg7[%c0_83, %c0_84, %c0_85] : memref<1x128x128xf32, #tpu.memory_space<vmem>>, vector<1x128x128xf32>
    %255 = vector.shape_cast %254 : vector<1x128x128xf32> to vector<128x128xf32>
    %cst_86 = arith.constant dense<0.000000e+00> : vector<2x128xf32>
    %256 = tpu.matmul %253, %255, %cst_86 {dimension_numbers = #tpu.dot_dimension_numbers<[1], [0], [0], [1], [0, 0, 1, 1], [], []>} : vector<2x128xf32>, vector<128x128xf32>, vector<2x128xf32> -> vector<2x128xf32>
    %c0_87 = arith.constant 0 : index
    %c0_88 = arith.constant 0 : index
    %c0_89 = arith.constant 0 : index
    %257 = vector.load %arg8[%c0_87, %c0_88, %c0_89] : memref<1x1x128xf32, #tpu.memory_space<vmem>>, vector<1x1x128xf32>
    %258 = vector.shape_cast %257 : vector<1x1x128xf32> to vector<1x128xf32>
    %259 = vector.broadcast %258 : vector<1x128xf32> to vector<2x128xf32>
    %260 = arith.addf %256, %259 : vector<2x128xf32>
    %c0_90 = arith.constant 0 : index
    %c0_91 = arith.constant 0 : index
    %c0_92 = arith.constant 0 : index
    %261 = vector.load %arg9[%c0_90, %c0_91, %c0_92] : memref<1x2x128xf32, #tpu.memory_space<vmem>>, vector<1x2x128xf32>
    %262 = vector.shape_cast %261 : vector<1x2x128xf32> to vector<2x128xf32>
    %263 = vector.shape_cast %260 : vector<2x128xf32> to vector<1x2x128xf32>
    tpu.vector_store %arg9[%c0_90, %c0_91, %c0_92], %263 {strides = array<i32>} : memref<1x2x128xf32, #tpu.memory_space<vmem>>, vector<1x2x128xf32>,
    return
  }
  func.func @transform_0(%arg0: i32) -> (i32, i32) {
    %c0_i32 = arith.constant 0 : i32
    %c0_i32_0 = arith.constant 0 : i32
    %c0_i32_1 = arith.constant 0 : i32
    return %c0_i32, %c0_i32_0 : i32, i32
  }
  func.func @transform_1(%arg0: i32) -> (i32, i32, i32) {
    %c0_i32 = arith.constant 0 : i32
    %c0_i32_0 = arith.constant 0 : i32
    %c0_i32_1 = arith.constant 0 : i32
    return %arg0, %c0_i32, %c0_i32_0 : i32, i32, i32
  }
  func.func @transform_2(%arg0: i32) -> (i32, i32, i32) {
    %c0_i32 = arith.constant 0 : i32
    %c0_i32_0 = arith.constant 0 : i32
    %c0_i32_1 = arith.constant 0 : i32
    return %arg0, %c0_i32, %c0_i32_0 : i32, i32, i32
  }
  func.func @transform_3(%arg0: i32) -> (i32, i32, i32) {
    %c0_i32 = arith.constant 0 : i32
    %c0_i32_0 = arith.constant 0 : i32
    %c0_i32_1 = arith.constant 0 : i32
    return %arg0, %c0_i32, %c0_i32_0 : i32, i32, i32
  }
  func.func @transform_4(%arg0: i32) -> (i32, i32, i32) {
    %c0_i32 = arith.constant 0 : i32
    %c0_i32_0 = arith.constant 0 : i32
    %c0_i32_1 = arith.constant 0 : i32
    return %arg0, %c0_i32, %c0_i32_0 : i32, i32, i32
  }
  func.func @transform_5(%arg0: i32) -> (i32, i32, i32) {
    %c0_i32 = arith.constant 0 : i32
    %c0_i32_0 = arith.constant 0 : i32
    %c0_i32_1 = arith.constant 0 : i32
    return %arg0, %c0_i32, %c0_i32_0 : i32, i32, i32
  }
  func.func @transform_6(%arg0: i32) -> (i32, i32, i32) {
    %c0_i32 = arith.constant 0 : i32
    %c0_i32_0 = arith.constant 0 : i32
    %c0_i32_1 = arith.constant 0 : i32
    return %arg0, %c0_i32, %c0_i32_0 : i32, i32, i32
  }
  func.func @transform_7(%arg0: i32) -> (i32, i32, i32) {
    %c0_i32 = arith.constant 0 : i32
    %c0_i32_0 = arith.constant 0 : i32
    %c0_i32_1 = arith.constant 0 : i32
    return %arg0, %c0_i32, %c0_i32_0 : i32, i32, i32
  }
  func.func @transform_8(%arg0: i32) -> (i32, i32, i32) {
    %c0_i32 = arith.constant 0 : i32
    %c0_i32_0 = arith.constant 0 : i32
    %c0_i32_1 = arith.constant 0 : i32
    return %arg0, %c0_i32, %c0_i32_0 : i32, i32, i32
  }
}

</mosaic_0001>

<bundles_post_ra>
// kernel: mtl_forward.1
= control target key start
LH: loop header
LB: loop body
LE: loop exit
PB: predicated region body
PF: predicated region fallthrough
CT: control target
= control target key end

     0   :  { %s4525_s0 = inlined_call_operand.vmem [shape: bf16[16,768], index: 0, kind: input, shape index: {}]   ;;  %s4526_s1 = inlined_call_operand.hbm [shape: bf16[5,768,256], index: 1, kind: input, shape index: {}]   ;;  %s4527_s2 = inlined_call_operand.hbm [shape: f32[5,1,256], index: 2, kind: input, shape index: {}]   ;;  %s4528_s3 = inlined_call_operand.hbm [shape: f32[5,64,256], index: 3, kind: input, shape index: {}]   ;;  %s4529_s4 = inlined_call_operand.hbm [shape: f32[5,64,128], index: 4, kind: input, shape index: {}]   ;;  %s4530_s5 = inlined_call_operand.hbm [shape: f32[5,1,128], index: 5, kind: input, shape index: {}]   ;;  %s4531_s6 = inlined_call_operand.hbm [shape: f32[5,128,128], index: 6, kind: input, shape index: {}]   ;;  %s4532_s7 = inlined_call_operand.hbm [shape: f32[5,1,128], index: 7, kind: input, shape index: {}]   ;;  %s4533_s8 = inlined_call_operand.vmem [shape: f32[5,2,128], index: 8, kind: output, shape index: {}]  }
   0x1   :  { %4547 = sst [smem:[#allocation24_spill]] %s4525_s0 }
   0x2   :  { %4548 = sst [smem:[#allocation25_spill]] %s4527_s2 }
   0x3   :  { %4549 = sst [smem:[#allocation26_spill]] %s4529_s4 }
   0x4   :  { %4550 = sst [smem:[#allocation27_spill]] %s4531_s6 }
   0x5   :  { %4551 = sst [smem:[#allocation28_spill]] %s4533_s8 }
   0x6   :  { %13 = vsyncpa [#allocation4], 0 }
   0x7   :  { %15 = vsyncpa [#allocation4 + $0x1], 0 }
   0x8   :  { %16 = vsyncpa [#allocation6], 0 }
   0x9   :  { %18 = vsyncpa [#allocation6 + $0x1], 0 }
   0xa   :  { %19 = vsyncpa [#allocation9], 0 }
   0xb   :  { %21 = vsyncpa [#allocation9 + $0x1], 0 }
   0xc   :  { %22 = vsyncpa [#allocation12], 0 }
   0xd   :  { %24 = vsyncpa [#allocation12 + $0x1], 0  ;;  %s3636_s27 = smov 0   ;;  %s3638_s28 = smov 0  }
   0xe   :  { %s3640_s29 = smov 0   ;;  %s3642_s30 = smov 0  }
   0xf LB: > { %4552 = sst [smem:[#allocation18_spill]] %s3575_s28  ;;  %s3655_s9 = sadd.s32 4294967295, %s3583_s30   ;;  %s3583_s30 = sphi %s3642_s30, %s4577_s30   ;;  %s3579_s29 = sphi %s3640_s29, %s4580_s29   ;;  %s3575_s28 = sphi %s3638_s28, %s4579_s28   ;;  %s3571_s27 = sphi %s3636_s27, %s4578_s27  }
  0x10   : > { %4553 = sst [smem:[#allocation19_spill]] %s3579_s29  ;;  %s3658_s10 = sadd.s32 1, %s3583_s30  }
  0x11   : > { %4554 = sst [smem:[#allocation20_spill]] %s3655_s9  ;;  %s55_s11 = ssub.s32 %s3583_s30, %s3658_s10 }
  0x12   : > { %4555 = sst [smem:[#allocation21_spill]] %s3658_s10  ;;  %s58_s12 = sadd.s32 1, %s3579_s29 }
  0x13   : > { %p56_p0 = scmp.eq.s32.totalorder %s55_s11, 0  ;;  %p65_p1 = scmp.ne.s32.totalorder %s3579_s29, %s3575_s28 }
  0x14   : > { %p66_p2 = scmp.eq.s32.totalorder %s3583_s30, 0  ;;  %p71_p3 = scmp.ne.s32.totalorder %s3575_s28, %s3571_s27 }
  0x15   : > { %s3668_s13 = scalar_select %p56_p0, %s3579_s29, %s58_s12  }
  0x16   : > { %p67_p4 = por %p66_p2, %p65_p1  ;;  %p72_p5 = scmp.eq.s32.totalorder %s3655_s9, 0 }
  0x17   : > { %4556 = sst [smem:[#allocation22_spill]] %s3668_s13  ;;  %p3190_p6 = scmp.lt.s32.totalorder %s3583_s30, 5 }
  0x18   : > { %p3672_p7 = por %p72_p5, %p71_p3  ;;  %s3677_s15 = sand.u32 1, %s3579_s29  }
  0x19   : > { %p3679_p8 = pnand %p3190_p6, %p67_p4  ;;  %s3684_s17 = sand.u32 1, %s3583_s30  }
  0x1a   : > { %s4557_s14 = scalar_select %p3672_p7, 1, 0 }
  0x1b   : > { %s2588_s18 = sshll.u32 %s3677_s15, 1  ;;  %s2589_s19 = sshll.u32 %s3583_s30, 1 }
  0x1c   : > { %4558 = sst [smem:[#allocation23_spill]] %s4557_s14  ;;  %s306_s20 = scalar_lea.vmem [#allocation5], %s2588_s18 }
  0x1d   : > { %s314_s21 = sshll.u32 %s306_s20, 4  ;;  %s4560_s2 = sld [smem:[#allocation25_spill]]  ;;  %s315_s21 = int_to_ptr.vmem [resolvable:$true] %s314_s21 }
  0x1e   : > { %s4534_s26 = scalar_lea.sflag [#allocation6], %s3684_s17  ;;  %p3694_p10 = pneg %p3679_p8 }
  0x23   : > { %s310_s24 = scalar_lea.hbm %s4560_s2, %s2589_s19  ;;  %s3334_s19 = scalar_lea.hbm %s4560_s2, 10 }
  0x24   : > { %s312_s25 = sshll.u32 %s310_s24, 4  ;;  %s313_s25 = int_to_ptr.hbm [resolvable:$true] %s312_s25 }
  0x25   : > { %s3327_s27 = sshra.s32 %s313_s25, 4  ;;  %s3328_s27 = int_to_ptr.hbm [resolvable:$true] %s3327_s27 }
  0x26   : > { %s3329_s11 = scalar_lea.hbm %s3328_s27, 2  ;;  %p3335_p13 = scmp.lt.s32.totalorder %s3328_s27, %s4560_s2 }
  0x27   : > { %p3330_p9 = scmp.ne.s32.totalorder %s3328_s27, %s3329_s11  ;;  %p3336_p0 = scmp.lt.s32.totalorder %s3334_s19, %s3329_s11 }
  0x29   : > { %p3332_p11 = pnand %p3694_p10, %p3330_p9  ;;  %p3337_p1 = por %p3336_p0, %p3335_p13 }
  0x2b   : > { %p3333_p12 = pneg %p3332_p11 }
  0x2d   : > { %p3338_p2 = pnand %p3337_p1, %p3333_p12 }
  0x2f   : > { %3341 = shalt.err (!%p3338_p2)
}
  0x30   : > { %3174 = dma.hbm_to_vmem [thread:$0]  (!%p3679_p8), %s313_s25, 32, %s315_s21, %s4534_s26  }
  0x31   : > { %p2599_p3 = scmp.ge.s32.totalorder %s3583_s30, 1  ;;  %p419_p4 = scmp.lt.s32.totalorder %s3583_s30, 6 }
  0x32   : > { %s2593_s27 = sshll.u32 %s3677_s15, 6  ;;  %s3047_s11 = sshll.u32 %s3583_s30, 6 }
  0x33   : > { %p3712_p5 = pnand %p2599_p3, %p419_p4  ;;  %s4563_s4 = sld [smem:[#allocation26_spill]] }
  0x34   : > { %s347_s22 = scalar_lea.vmem [#allocation8], %s2593_s27  ;;  %s2590_s13 = sshll.u32 %s3677_s15, 7 }
  0x35   : > { %s355_s23 = sshll.u32 %s347_s22, 4  ;;  %s4541_s21 = scalar_lea.sflag [#allocation9], %s3684_s17  ;;  %s356_s23 = int_to_ptr.vmem [resolvable:$true] %s355_s23 }
  0x39   : > { %s352_s19 = scalar_lea.hbm %s4563_s4, %s3047_s11  ;;  %s3364_s8 = scalar_lea.hbm %s4563_s4, 320 }
  0x3a   : > { %s353_s2 = sshll.u32 %s352_s19, 4  ;;  %s354_s2 = int_to_ptr.hbm [resolvable:$true] %s353_s2 }
  0x3b   : > { %s3357_s25 = sshra.s32 %s354_s2, 4  ;;  %s3358_s25 = int_to_ptr.hbm [resolvable:$true] %s3357_s25 }
  0x3c   : > { %s3359_s26 = scalar_lea.hbm %s3358_s25, 64  ;;  %p3365_p12 = scmp.lt.s32.totalorder %s3358_s25, %s4563_s4 }
  0x3d   : > { %p3360_p6 = scmp.ne.s32.totalorder %s3358_s25, %s3359_s26  ;;  %p3366_p13 = scmp.lt.s32.totalorder %s3364_s8, %s3359_s26 }
  0x3f   : > { %p3362_p9 = pnand %p3360_p6, %p3694_p10  ;;  %p3367_p0 = por %p3366_p13, %p3365_p12 }
  0x41   : > { %p3363_p11 = pneg %p3362_p9 }
  0x43   : > { %p3368_p1 = pnand %p3367_p0, %p3363_p11 }
  0x45   : > { %3371 = shalt.err (!%p3368_p1)
}
  0x46   : > { %s4542_s27 = smov 128   ;;  %s3586_s20 = smov 8  }
  0x47   : > { %3180 = dma.hbm_to_vmem [thread:$0]  (!%p3679_p8), %s354_s2, 1024, %s356_s23, %s4541_s21, %s4542_s27, %s4542_s27, %s3586_s20  }
  0x48   : > { %s3046_s29 = sshll.u32 %s3583_s30, 7  ;;  %s325_s26 = scalar_lea.vmem [#allocation7], %s2590_s13 }
  0x49   : > { %s330_s8 = scalar_lea.hbm %s4528_s3, %s3046_s29  ;;  %s333_s22 = sshll.u32 %s325_s26, 4  ;;  %s3742_s22 = int_to_ptr.vmem [resolvable:$true] %s333_s22 }
  0x4a   : > { %s331_s25 = sshll.u32 %s330_s8, 4  ;;  %s4564_s6 = sld [smem:[#allocation27_spill]]  ;;  %s3744_s25 = int_to_ptr.hbm [resolvable:$true] %s331_s25 }
  0x4b   : > { %s386_s0 = scalar_lea.vmem [#allocation11], %s2590_s13  ;;  %s383_s23 = scalar_lea.sflag [#allocation12], %s3684_s17 }
  0x4c   : > { %s394_s9 = sshll.u32 %s386_s0, 4  ;;  %s395_s9 = int_to_ptr.vmem [resolvable:$true] %s394_s9 }
  0x50   : > { %s391_s4 = scalar_lea.hbm %s4564_s6, %s3046_s29  ;;  %s3394_s21 = scalar_lea.hbm %s4564_s6, 640 }
  0x51   : > { %s392_s2 = sshll.u32 %s391_s4, 4  ;;  %s393_s2 = int_to_ptr.hbm [resolvable:$true] %s392_s2 }
  0x52   : > { %s3387_s10 = sshra.s32 %s393_s2, 4  ;;  %s3388_s10 = int_to_ptr.hbm [resolvable:$true] %s3387_s10 }
  0x53   : > { %s3389_s19 = scalar_lea.hbm %s3388_s10, 128  ;;  %p3395_p6 = scmp.lt.s32.totalorder %s3388_s10, %s4564_s6 }
  0x54   : > { %p3390_p2 = scmp.ne.s32.totalorder %s3388_s10, %s3389_s19  ;;  %p3396_p9 = scmp.lt.s32.totalorder %s3394_s21, %s3389_s19 }
  0x56   : > { %p3392_p3 = pnand %p3390_p2, %p3694_p10  ;;  %p3397_p11 = por %p3396_p9, %p3395_p6 }
  0x58   : > { %p3393_p4 = pneg %p3392_p3 }
  0x5a   : > { %p3398_p12 = pnand %p3397_p11, %p3393_p4 }
  0x5c   : > { %3401 = shalt.err (!%p3398_p12)
}
  0x5d   : > { %s4565_s0 = smov 128   ;;  %s3151_s4 = smul.u32 768, %s3677_s15 }
  0x5e   : > { %3186 = dma.hbm_to_vmem [thread:$0]  (!%p3679_p8), %s393_s2, 2048, %s395_s9, %s383_s23, %s4565_s0, %s4565_s0, %s3586_s20  }
  0x5f   : > { %s3152_s13 = smul.u32 768, %s3583_s30  ;;  %s284_s11 = scalar_lea.vmem [#allocation3], %s3151_s4 }
  0x60   : > { %s292_s10 = sshll.u32 %s284_s11, 4  ;;  %s371_s18 = scalar_lea.hbm %s4530_s5, %s3583_s30  ;;  %s293_s10 = int_to_ptr.vmem [resolvable:$true] %s292_s10 }
  0x61   : > { %s289_s29 = scalar_lea.hbm %s4526_s1, %s3152_s13  ;;  %s281_s6 = scalar_lea.sflag [#allocation4], %s3677_s15 }
  0x62   : > { %s290_s19 = sshll.u32 %s289_s29, 4  ;;  %s3424_s4 = scalar_lea.hbm %s4526_s1, 3840  ;;  %s291_s19 = int_to_ptr.hbm [resolvable:$true] %s290_s19 }
  0x63   : > { %s3417_s14 = sshra.s32 %s291_s19, 4  ;;  %s3418_s14 = int_to_ptr.hbm [resolvable:$true] %s3417_s14 }
  0x64   : > { %s3419_s28 = scalar_lea.hbm %s3418_s14, 768  ;;  %p3425_p2 = scmp.lt.s32.totalorder %s3418_s14, %s4526_s1 }
  0x65   : > { %p3420_p13 = scmp.ne.s32.totalorder %s3418_s14, %s3419_s28  ;;  %p3426_p3 = scmp.lt.s32.totalorder %s3424_s4, %s3419_s28 }
  0x67   : > { %p3422_p0 = pnand %p3420_p13, %p3694_p10  ;;  %p3427_p4 = por %p3426_p3, %p3425_p2 }
  0x69   : > { %p3423_p1 = pneg %p3422_p0 }
  0x6b   : > { %p3428_p6 = pnand %p3427_p4, %p3423_p1 }
  0x6d   : > { %3431 = shalt.err (!%p3428_p6)
}
  0x6e   : > { %3171 = dma.hbm_to_vmem [thread:$0]  (!%p3679_p8), %s291_s19, 12288, %s293_s10, %s281_s6, %s4565_s0, %s4565_s0, %s3586_s20  }
  0x6f   : > { %s3447_s21 = sshra.s32 %s3744_s25, 4  ;;  %s3454_s11 = scalar_lea.hbm %s4528_s3, 640  ;;  %s3448_s21 = int_to_ptr.hbm [resolvable:$true] %s3447_s21 }
  0x70   : > { %s3449_s29 = scalar_lea.hbm %s3448_s21, 128  ;;  %p3455_p13 = scmp.lt.s32.totalorder %s3448_s21, %s4528_s3 }
  0x71   : > { %p3450_p9 = scmp.ne.s32.totalorder %s3448_s21, %s3449_s29  ;;  %p3456_p0 = scmp.lt.s32.totalorder %s3454_s11, %s3449_s29 }
  0x73   : > { %p3452_p11 = pnand %p3450_p9, %p3694_p10  ;;  %p3457_p1 = por %p3456_p0, %p3455_p13 }
  0x75   : > { %p3453_p12 = pneg %p3452_p11 }
  0x77   : > { %p3458_p2 = pnand %p3457_p1, %p3453_p12 }
  0x79   : > { %3461 = shalt.err (!%p3458_p2)
}
  0x7a   : > { %s3587_s6 = smov 256   ;;  %s3588_s20 = smov 16  }
  0x7b   : > { %s4566_s0 = scalar_lea.sflag [#allocation6], %s3684_s17  ;;  %s373_s9 = sshll.u32 %s371_s18, 4  ;;  %s374_s9 = int_to_ptr.hbm [resolvable:$true] %s373_s9 }
  0x7c   : > { %3177 = dma.hbm_to_vmem [thread:$0]  (!%p3679_p8), %s3744_s25, 2048, %s3742_s22, %s4566_s0, %s3587_s6, %s3587_s6, %s3588_s20  }
  0x7d   : > { %s368_s2 = scalar_lea.vmem [#allocation10], %s3677_s15  ;;  %s3477_s13 = sshra.s32 %s374_s9, 4  ;;  %s3478_s13 = int_to_ptr.hbm [resolvable:$true] %s3477_s13 }
  0x7e   : > { %s375_s4 = sshll.u32 %s368_s2, 4  ;;  %s3479_s27 = scalar_lea.hbm %s3478_s13, 1  ;;  %s376_s4 = int_to_ptr.vmem [resolvable:$true] %s375_s4 }
  0x7f   : > { %p3480_p3 = scmp.ne.s32.totalorder %s3478_s13, %s3479_s27  ;;  %s3484_s22 = scalar_lea.hbm %s4530_s5, 5 }
  0x80   : > { %p3485_p9 = scmp.lt.s32.totalorder %s3478_s13, %s4530_s5  ;;  %p3486_p11 = scmp.lt.s32.totalorder %s3484_s22, %s3479_s27 }
  0x81   : > { %p3482_p4 = pnand %p3480_p3, %p3694_p10 }
  0x82   : > { %p3487_p12 = por %p3486_p11, %p3485_p9 }
  0x83   : > { %p3483_p6 = pneg %p3482_p4 }
  0x85   : > { %p3488_p13 = pnand %p3487_p12, %p3483_p6 }
  0x87   : > { %3491 = shalt.err (!%p3488_p13)
}
  0x88   : > { %s4567_s18 = scalar_lea.sflag [#allocation9], %s3684_s17  ;;  %s410_s8 = scalar_lea.hbm %s4532_s7, %s3583_s30 }
  0x89   : > { %3183 = dma.hbm_to_vmem [thread:$0]  (!%p3679_p8), %s374_s9, 16, %s376_s4, %s4567_s18  }
  0x8a   : > { %s412_s26 = sshll.u32 %s410_s8, 4  ;;  %s407_s6 = scalar_lea.vmem [#allocation13], %s3677_s15  ;;  %s413_s26 = int_to_ptr.hbm [resolvable:$true] %s412_s26 }
  0x8b   : > { %s414_s20 = sshll.u32 %s407_s6, 4  ;;  %s3507_s0 = sshra.s32 %s413_s26, 4  ;;  %s415_s20 = int_to_ptr.vmem [resolvable:$true] %s414_s20  ;;  %s3508_s0 = int_to_ptr.hbm [resolvable:$true] %s3507_s0 }
  0x8c   : > { %s3509_s10 = scalar_lea.hbm %s3508_s0, 1  ;;  %s3514_s9 = scalar_lea.hbm %s4532_s7, 5 }
  0x8d   : > { %p3510_p0 = scmp.ne.s32.totalorder %s3508_s0, %s3509_s10  ;;  %p3515_p3 = scmp.lt.s32.totalorder %s3508_s0, %s4532_s7 }
  0x8e   : > { %p3516_p4 = scmp.lt.s32.totalorder %s3514_s9, %s3509_s10 }
  0x8f   : > { %p3512_p1 = pnand %p3510_p0, %p3694_p10 }
  0x90   : > { %p3517_p6 = por %p3516_p4, %p3515_p3 }
  0x91   : > { %p3513_p2 = pneg %p3512_p1 }
  0x93   : > { %p3518_p9 = pnand %p3517_p6, %p3513_p2 }
  0x95   : > { %3521 = shalt.err (!%p3518_p9)
}
  0x96   : > { %3189 = dma.hbm_to_vmem [thread:$0]  (!%p3679_p8), %s413_s26, 16, %s415_s20, %s383_s23  }
  0x97   : > { %423 = sbr.rel (%p3712_p5) target bundleno = 3701 (0xe75), region = 52  ;;  %s4568_s30 = sld [smem:[#allocation18_spill]] (!%p3712_p5) }
  0x9d   : > { %s3841_s12 = sand.u32 1, %s4568_s30  }
  0x9e   : > { %s3153_s27 = smul.u32 768, %s3841_s12  ;;  %s426_s21 = scalar_lea.sflag [#allocation4], %s3841_s12 }
  0xa0   : > { %s3845_s29 = scalar_lea.vmem [#allocation3], %s3153_s27 }
  0xa1   : > { %3554 = dma.done.wait (%p3672_p7), %s426_s21, 12288  }
  0xa2   : > { %3556 = vsyncadd (%p3672_p7), %s426_s21, 4294955008  ;;  %s4570_s16 = sld [smem:[#allocation20_spill]]  ;;  %s2600_s24 = sshll.u32 %s3841_s12, 1 }
  0xa3   : > { %s3853_s22 = scalar_lea.vmem [#allocation5], %s2600_s24 }
  0xa8   : > { %s435_s17 = sand.u32 1, %s4570_s16  }
  0xa9   : > { %s436_s23 = scalar_lea.sflag [#allocation6], %s435_s17 }
  0xaa   : > { %3558 = dma.done.wait (%p3672_p7), %s436_s23, 2080  }
  0xab   : > { %3560 = vsyncadd (%p3672_p7), %s436_s23, 4294965216  ;;  %s2601_s25 = sshll.u32 %s3841_s12, 7  ;;  %s2602_s14 = sshll.u32 %s3841_s12, 6 }
  0xac   : > { %s3861_s18 = scalar_lea.vmem [#allocation7], %s2601_s25  ;;  %s456_s28 = scalar_lea.sflag [#allocation9], %s435_s17 }
  0xad   : > { %s3863_s11 = scalar_lea.vmem [#allocation8], %s2602_s14 }
  0xae   : > { %3562 = dma.done.wait (%p3672_p7), %s456_s28, 1040  }
  0xaf   : > { %3564 = vsyncadd (%p3672_p7), %s456_s28, 4294966256  ;;  %s468_s8 = scalar_lea.vmem [#allocation10], %s3841_s12  ;;  %s475_s26 = scalar_lea.sflag [#allocation12], %s435_s17 }
  0xb0   : > { %s3870_s6 = scalar_lea.vmem [#allocation11], %s2601_s25 }
  0xb1   : > { %3566 = dma.done.wait (%p3672_p7), %s475_s26, 2064  }
  0xb2   : > { %3568 = vsyncadd (%p3672_p7), %s475_s26, 4294965232  ;;  %v2687_v0 = vld [vmem:[%s3845_s29 + $0x70] sm:$0xf]  ;;  %v3070_v1 = vld [vmem:[%s3845_s29 + $0x74] sm:$0xf0]  ;;  %s4571_s10 = sld [smem:[#allocation24_spill]] }
  0xb3   : > { %v2751_v2 = vld [vmem:[%s3845_s29 + $0xf0] sm:$0xf]  ;;  %v2688_v3 = vor.u32 %v3070_v1, %v2687_v0  ;;  %v3086_v4 = vld [vmem:[%s3845_s29 + $0xf4] sm:$0xf0]  ;;  %v2679_v11 = vld [vmem:[%s3845_s29 + $0x60] sm:$0xf] }
  0xb4   : > { %v2815_v5 = vld [vmem:[%s3845_s29 + $0x170] sm:$0xf]  ;;  %v3102_v6 = vld [vmem:[%s3845_s29 + $0x174] sm:$0xf0]  ;;  %v2752_v7 = vor.u32 %v3086_v4, %v2751_v2  ;;  %v3068_v13 = vld [vmem:[%s3845_s29 + $0x64] sm:$0xf0] }
  0xb5   : > { %v2816_v8 = vor.u32 %v3102_v6, %v2815_v5  ;;  %v2879_v9 = vld [vmem:[%s3845_s29 + $0x1f0] sm:$0xf]  ;;  %v3118_v10 = vld [vmem:[%s3845_s29 + $0x1f4] sm:$0xf0]  ;;  %1170 = vmatpush.bf16.msra.mxu0 %v2688_v3  ;;  %v2743_v14 = vld [vmem:[%s3845_s29 + $0xe0] sm:$0xf]  ;;  %v2680_v16 = vor.u32 %v3068_v13, %v2679_v11 }
  0xb6   : > { %v2880_v12 = vor.u32 %v3118_v10, %v2879_v9  ;;  %v3084_v15 = vld [vmem:[%s3845_s29 + $0xe4] sm:$0xf0]  ;;  %1184 = vmatpush.bf16.msra.mxu1 %v2752_v7  ;;  %v2807_v18 = vld [vmem:[%s3845_s29 + $0x160] sm:$0xf]  ;;  %v2671_v23 = vld [vmem:[%s3845_s29 + $0x50] sm:$0xf] }
  0xb7   : > { %1198 = vmatpush.bf16.msra.mxu2 %v2816_v8  ;;  %v2744_v17 = vor.u32 %v3084_v15, %v2743_v14  ;;  %v3100_v19 = vld [vmem:[%s3845_s29 + $0x164] sm:$0xf0]  ;;  %v2871_v20 = vld [vmem:[%s3845_s29 + $0x1e0] sm:$0xf]  ;;  %v3066_v24 = vld [vmem:[%s3845_s29 + $0x54] sm:$0xf0] }
  0xb8   : > { %1212 = vmatpush.bf16.msra.mxu3 %v2880_v12  ;;  %v2808_v21 = vor.u32 %v3100_v19, %v2807_v18  ;;  %v3116_v22 = vld [vmem:[%s3845_s29 + $0x1e4] sm:$0xf0]  ;;  %v2735_v26 = vld [vmem:[%s3845_s29 + $0xd0] sm:$0xf]  ;;  %v3082_v27 = vld [vmem:[%s3845_s29 + $0xd4] sm:$0xf0]  ;;  %v2672_v29 = vor.u32 %v3066_v24, %v2671_v23 }
  0xb9   : > { %v2872_v25 = vor.u32 %v3116_v22, %v2871_v20  ;;  %v2799_v28 = vld [vmem:[%s3845_s29 + $0x150] sm:$0xf]  ;;  %1171 = vmatpush.bf16.msra.mxu0 %v2680_v16  ;;  %v3098_v30 = vld [vmem:[%s3845_s29 + $0x154] sm:$0xf0]  ;;  %v2736_v33 = vor.u32 %v3082_v27, %v2735_v26  ;;  %v2663_v35 = vld [vmem:[%s3845_s29 + $0x40] sm:$0xf] }
  0xba   : > { %v2863_v31 = vld [vmem:[%s3845_s29 + $0x1d0] sm:$0xf]  ;;  %v3114_v32 = vld [vmem:[%s3845_s29 + $0x1d4] sm:$0xf0]  ;;  %1185 = vmatpush.bf16.msra.mxu1 %v2744_v17  ;;  %v2800_v34 = vor.u32 %v3098_v30, %v2799_v28  ;;  %v3064_v36 = vld [vmem:[%s3845_s29 + $0x44] sm:$0xf0] }
  0xbb   : > { %1199 = vmatpush.bf16.msra.mxu2 %v2808_v21  ;;  %v2727_v37 = vld [vmem:[%s3845_s29 + $0xc0] sm:$0xf]  ;;  %v2864_v38 = vor.u32 %v3114_v32, %v2863_v31  ;;  %v3080_v39 = vld [vmem:[%s3845_s29 + $0xc4] sm:$0xf0]  ;;  %v2664_v44 = vor.u32 %v3064_v36, %v2663_v35  ;;  %v2655_v47 = vld [vmem:[%s3845_s29 + $0x30] sm:$0xf] }
  0xbc   : > { %1213 = vmatpush.bf16.msra.mxu3 %v2872_v25  ;;  %v2791_v40 = vld [vmem:[%s3845_s29 + $0x140] sm:$0xf]  ;;  %v3096_v41 = vld [vmem:[%s3845_s29 + $0x144] sm:$0xf0]  ;;  %v2728_v45 = vor.u32 %v3080_v39, %v2727_v37  ;;  %v3062_v48 = vld [vmem:[%s3845_s29 + $0x34] sm:$0xf0] }
  0xbd   : > { %v2855_v42 = vld [vmem:[%s3845_s29 + $0x1c0] sm:$0xf]  ;;  %v3112_v43 = vld [vmem:[%s3845_s29 + $0x1c4] sm:$0xf0]  ;;  %1172 = vmatpush.bf16.msra.mxu0 %v2672_v29  ;;  %v2792_v46 = vor.u32 %v3096_v41, %v2791_v40  ;;  %v2719_v49 = vld [vmem:[%s3845_s29 + $0xb0] sm:$0xf]  ;;  %v2656_v56 = vor.u32 %v3062_v48, %v2655_v47 }
  0xbe   : > { %1186 = vmatpush.bf16.msra.mxu1 %v2736_v33  ;;  %v2856_v50 = vor.u32 %v3112_v43, %v2855_v42  ;;  %v3078_v51 = vld [vmem:[%s3845_s29 + $0xb4] sm:$0xf0]  ;;  %v2783_v52 = vld [vmem:[%s3845_s29 + $0x130] sm:$0xf]  ;;  %v2647_v59 = vld [vmem:[%s3845_s29 + $0x20] sm:$0xf] }
  0xbf   : > { %1200 = vmatpush.bf16.msra.mxu2 %v2800_v34  ;;  %v3094_v53 = vld [vmem:[%s3845_s29 + $0x134] sm:$0xf0]  ;;  %v2847_v54 = vld [vmem:[%s3845_s29 + $0x1b0] sm:$0xf]  ;;  %v2720_v57 = vor.u32 %v3078_v51, %v2719_v49  ;;  %v3060_v60 = vld [vmem:[%s3845_s29 + $0x24] sm:$0xf0] }
  0xc0   : > { %1214 = vmatpush.bf16.msra.mxu3 %v2864_v38  ;;  %v3110_v55 = vld [vmem:[%s3845_s29 + $0x1b4] sm:$0xf0]  ;;  %v2784_v58 = vor.u32 %v3094_v53, %v2783_v52  ;;  %v2711_v61 = vld [vmem:[%s3845_s29 + $0xa0] sm:$0xf]  ;;  %v3076_v63 = vld [vmem:[%s3845_s29 + $0xa4] sm:$0xf0]  ;;  %v2648_v4 = vor.u32 %v3060_v60, %v2647_v59 }
  0xc1   : > { %1173 = vmatpush.bf16.msra.mxu0 %v2664_v44  ;;  %v2848_v62 = vor.u32 %v3110_v55, %v2847_v54  ;;  %v2775_v0 = vld [vmem:[%s3845_s29 + $0x120] sm:$0xf]  ;;  %v3092_v1 = vld [vmem:[%s3845_s29 + $0x124] sm:$0xf0]  ;;  %v2712_v5 = vor.u32 %v3076_v63, %v2711_v61  ;;  %v2639_v7 = vld [vmem:[%s3845_s29 + $0x10] sm:$0xf] }
  0xc2   : > { %1187 = vmatpush.bf16.msra.mxu1 %v2728_v45  ;;  %v2839_v2 = vld [vmem:[%s3845_s29 + $0x1a0] sm:$0xf]  ;;  %v3108_v3 = vld [vmem:[%s3845_s29 + $0x1a4] sm:$0xf0]  ;;  %v2776_v6 = vor.u32 %v3092_v1, %v2775_v0  ;;  %v3058_v8 = vld [vmem:[%s3845_s29 + $0x14] sm:$0xf0] }
  0xc3   : > { %1201 = vmatpush.bf16.msra.mxu2 %v2792_v46  ;;  %v2703_v9 = vld [vmem:[%s3845_s29 + $0x90] sm:$0xf]  ;;  %v2840_v10 = vor.u32 %v3108_v3, %v2839_v2  ;;  %v3074_v11 = vld [vmem:[%s3845_s29 + $0x94] sm:$0xf0]  ;;  %v2640_v16 = vor.u32 %v3058_v8, %v2639_v7  ;;  %v2631_v17 = vld [vmem:[%s3845_s29] sm:$0xf] }
  0xc4   : > { %1215 = vmatpush.bf16.msra.mxu3 %v2856_v50  ;;  %v2767_v12 = vld [vmem:[%s3845_s29 + $0x110] sm:$0xf]  ;;  %v3090_v13 = vld [vmem:[%s3845_s29 + $0x114] sm:$0xf0]  ;;  %v3056_v18 = vld [vmem:[%s3845_s29 + $0x4] sm:$0xf0]  ;;  %v2704_v19 = vor.u32 %v3074_v11, %v2703_v9 }
  0xc5   : > { %1174 = vmatpush.bf16.msra.mxu0 %v2656_v56  ;;  %v2831_v14 = vld [vmem:[%s3845_s29 + $0x190] sm:$0xf]  ;;  %v3106_v15 = vld [vmem:[%s3845_s29 + $0x194] sm:$0xf0]  ;;  %v2768_v20 = vor.u32 %v3090_v13, %v2767_v12  ;;  %v2695_v21 = vld [vmem:[%s3845_s29 + $0x80] sm:$0xf]  ;;  %v2632_v31 = vor.u32 %v3056_v18, %v2631_v17 }
  0xc6   : > { %1188 = vmatpush.bf16.msra.mxu1 %v2720_v57  ;;  %v3072_v22 = vld [vmem:[%s3845_s29 + $0x84] sm:$0xf0]  ;;  %v2759_v23 = vld [vmem:[%s3845_s29 + $0x100] sm:$0xf]  ;;  %v2832_v24 = vor.u32 %v3106_v15, %v2831_v14  ;;  %v2943_v28 = vld [vmem:[%s3845_s29 + $0x270] sm:$0xf] }
  0xc7   : > { %1202 = vmatpush.bf16.msra.mxu2 %v2784_v58  ;;  %v3088_v25 = vld [vmem:[%s3845_s29 + $0x104] sm:$0xf0]  ;;  %v2823_v26 = vld [vmem:[%s3845_s29 + $0x180] sm:$0xf]  ;;  %v3134_v29 = vld [vmem:[%s3845_s29 + $0x274] sm:$0xf0]  ;;  %v2696_v35 = vor.u32 %v3072_v22, %v2695_v21 }
  0xc8   : > { %1216 = vmatpush.bf16.msra.mxu3 %v2848_v62  ;;  %v3104_v27 = vld [vmem:[%s3845_s29 + $0x184] sm:$0xf0]  ;;  %v3007_v30 = vld [vmem:[%s3845_s29 + $0x2f0] sm:$0xf]  ;;  %v3150_v32 = vld [vmem:[%s3845_s29 + $0x2f4] sm:$0xf0]  ;;  %v2760_v36 = vor.u32 %v3088_v25, %v2759_v23  ;;  %v2944_v40 = vor.u32 %v3134_v29, %v2943_v28 }
  0xc9   : > { %1175 = vmatpush.bf16.msra.mxu0 %v2648_v4  ;;  %v3069_v33 = vld [vmem:[%s3845_s29 + $0x74] sm:$0xf]  ;;  %v2689_v34 = vld [vmem:[%s3845_s29 + $0x78] sm:$0xf0]  ;;  %v2824_v39 = vor.u32 %v3104_v27, %v2823_v26  ;;  %v2935_v41 = vld [vmem:[%s3845_s29 + $0x260] sm:$0xf]  ;;  %v3008_v42 = vor.u32 %v3150_v32, %v3007_v30 }
  0xca   : > { %1189 = vmatpush.bf16.msra.mxu1 %v2712_v5  ;;  %v3085_v37 = vld [vmem:[%s3845_s29 + $0xf4] sm:$0xf]  ;;  %v2753_v38 = vld [vmem:[%s3845_s29 + $0xf8] sm:$0xf0]  ;;  %v2692_v43 = vor.u32 %v3069_v33, %v2689_v34  ;;  %v3132_v44 = vld [vmem:[%s3845_s29 + $0x264] sm:$0xf0] }
  0xcb   : > { %1203 = vmatpush.bf16.msra.mxu2 %v2776_v6  ;;  %v2999_v45 = vld [vmem:[%s3845_s29 + $0x2e0] sm:$0xf]  ;;  %v3148_v46 = vld [vmem:[%s3845_s29 + $0x2e4] sm:$0xf0]  ;;  %v2756_v47 = vor.u32 %v3085_v37, %v2753_v38  ;;  %v3067_v48 = vld [vmem:[%s3845_s29 + $0x64] sm:$0xf]  ;;  %v2936_v54 = vor.u32 %v3132_v44, %v2935_v41 }
  0xcc   : > { %1217 = vmatpush.bf16.msra.mxu3 %v2840_v10  ;;  %v2681_v49 = vld [vmem:[%s3845_s29 + $0x68] sm:$0xf0]  ;;  %v3083_v50 = vld [vmem:[%s3845_s29 + $0xe4] sm:$0xf]  ;;  %v2607_v52 = vld [vmem:[%s4571_s10] sm:$0xf]  ;;  %v3000_v59 = vor.u32 %v3148_v46, %v2999_v45 }
  0xcd   : > { %1176 = vmatpush.bf16.msra.mxu0 %v2640_v16  ;;  %v2745_v51 = vld [vmem:[%s3845_s29 + $0xe8] sm:$0xf0]  ;;  %v3052_v53 = vld [vmem:[%s4571_s10 + $0x14] sm:$0xf0]  ;;  %v2927_v55 = vld [vmem:[%s3845_s29 + $0x250] sm:$0xf]  ;;  %v2684_v60 = vor.u32 %v3067_v48, %v2681_v49 }
  0xce   : > { %1190 = vmatpush.bf16.msra.mxu1 %v2704_v19  ;;  %v3130_v56 = vld [vmem:[%s3845_s29 + $0x254] sm:$0xf0]  ;;  %v2991_v57 = vld [vmem:[%s3845_s29 + $0x2d0] sm:$0xf]  ;;  %v3965_v58 = vor.u32 %v3052_v53, %v2607_v52  ;;  %v3065_v62 = vld [vmem:[%s3845_s29 + $0x54] sm:$0xf]  ;;  %v2748_v0 = vor.u32 %v3083_v50, %v2745_v51 }
  0xcf   : > { %1204 = vmatpush.bf16.msra.mxu2 %v2768_v20  ;;  %v3146_v61 = vld [vmem:[%s3845_s29 + $0x2d4] sm:$0xf0]  ;;  %v2673_v63 = vld [vmem:[%s3845_s29 + $0x58] sm:$0xf0]  ;;  %v3081_v1 = vld [vmem:[%s3845_s29 + $0xd4] sm:$0xf]  ;;  %v2928_v8 = vor.u32 %v3130_v56, %v2927_v55 }
  0xd0   : > { %1218 = vmatpush.bf16.msra.mxu3 %v2832_v24  ;;  %v3049_v2 = vld [vmem:[%s4571_s10 + $0x4] sm:$0xf]  ;;  %v2609_v3 = vld [vmem:[%s4571_s10 + $0x18] sm:$0xf0]  ;;  %v2737_v4 = vld [vmem:[%s3845_s29 + $0xd8] sm:$0xf0]  ;;  %v2992_v12 = vor.u32 %v3146_v61, %v2991_v57  ;;  %v2676_v13 = vor.u32 %v3065_v62, %v2673_v63 }
  0xd1   : > { %1177 = vmatpush.bf16.msra.mxu0 %v2632_v31  ;;  %v3979_v5 = vor.u32 %v3049_v2, %v2609_v3  ;;  %v2615_v6 = vld [vmem:[%s4571_s10 + $0x8] sm:$0xf]  ;;  %v3053_v7 = vld [vmem:[%s4571_s10 + $0x1c] sm:$0xf0]  ;;  %v2919_v9 = vld [vmem:[%s3845_s29 + $0x240] sm:$0xf]  ;;  %v2740_v17 = vor.u32 %v3081_v1, %v2737_v4 }
  0xd2   : > { %1191 = vmatpush.bf16.msra.mxu1 %v2696_v35  ;;  %v3128_v10 = vld [vmem:[%s3845_s29 + $0x244] sm:$0xf0]  ;;  %v3989_v11 = vor.u32 %v3053_v7, %v2615_v6  ;;  %v2983_v14 = vld [vmem:[%s3845_s29 + $0x2c0] sm:$0xf]  ;;  %v3063_v16 = vld [vmem:[%s3845_s29 + $0x44] sm:$0xf] }
  0xd3   : > { %1205 = vmatpush.bf16.msra.mxu2 %v2760_v36  ;;  %v3144_v15 = vld [vmem:[%s3845_s29 + $0x2c4] sm:$0xf0]  ;;  %v2665_v18 = vld [vmem:[%s3845_s29 + $0x48] sm:$0xf0]  ;;  %v3050_v19 = vld [vmem:[%s4571_s10 + $0xc] sm:$0xf]  ;;  %v2920_v24 = vor.u32 %v3128_v10, %v2919_v9 }
  0xd4   : > { %1219 = vmatpush.bf16.msra.mxu3 %v2824_v39  ;;  %1178 = vmatmul.bf16.vlgmr.msra.gmra.mxu0 %v3965_v58  ;;  %v2617_v20 = vld [vmem:[%s4571_s10 + $0x20] sm:$0xf0]  ;;  %v3079_v21 = vld [vmem:[%s3845_s29 + $0xc4] sm:$0xf]  ;;  %v2729_v22 = vld [vmem:[%s3845_s29 + $0xc8] sm:$0xf0]  ;;  %v2984_v25 = vor.u32 %v3144_v15, %v2983_v14  ;;  %v2668_v26 = vor.u32 %v3063_v16, %v2665_v18 }
  0xd5   : > { %1226 = vmatpush.bf16.msrb.mxu0 %v2944_v40  ;;  %1192 = vmatmul.bf16.vlgmr.msra.gmra.mxu1 %v3979_v5  ;;  %v4005_v23 = vor.u32 %v3050_v19, %v2617_v20  ;;  %v2911_v27 = vld [vmem:[%s3845_s29 + $0x230] sm:$0xf]  ;;  %v3126_v28 = vld [vmem:[%s3845_s29 + $0x234] sm:$0xf0]  ;;  %v2732_v30 = vor.u32 %v3079_v21, %v2729_v22  ;;  %v3061_v32 = vld [vmem:[%s3845_s29 + $0x34] sm:$0xf] }
  0xd6   : > { %1240 = vmatpush.bf16.msrb.mxu1 %v3008_v42  ;;  %1206 = vmatmul.bf16.vlgmr.msra.gmra.mxu2 %v3989_v11  ;;  %v2975_v29 = vld [vmem:[%s3845_s29 + $0x2b0] sm:$0xf]  ;;  %v3142_v31 = vld [vmem:[%s3845_s29 + $0x2b4] sm:$0xf0]  ;;  %v2657_v33 = vld [vmem:[%s3845_s29 + $0x38] sm:$0xf0]  ;;  %v2912_v36 = vor.u32 %v3126_v28, %v2911_v27 }
  0xd7   : > { %1254 = vmatpush.bf16.msrb.mxu2 %v2692_v43  ;;  %v3077_v34 = vld [vmem:[%s3845_s29 + $0xb4] sm:$0xf]  ;;  %v2721_v35 = vld [vmem:[%s3845_s29 + $0xb8] sm:$0xf0]  ;;  %1220 = vmatmul.bf16.vlgmr.msra.gmra.mxu3 %v4005_v23  ;;  %v2976_v37 = vor.u32 %v3142_v31, %v2975_v29  ;;  %v2660_v38 = vor.u32 %v3061_v32, %v2657_v33  ;;  %v2903_v39 = vld [vmem:[%s3845_s29 + $0x220] sm:$0xf] }
  0xd8   : > { %1268 = vmatpush.bf16.msrb.mxu3 %v2756_v47  ;;  %v3124_v40 = vld [vmem:[%s3845_s29 + $0x224] sm:$0xf0]  ;;  %v2967_v41 = vld [vmem:[%s3845_s29 + $0x2a0] sm:$0xf]  ;;  %v2724_v42 = vor.u32 %v3077_v34, %v2721_v35  ;;  %v3059_v44 = vld [vmem:[%s3845_s29 + $0x24] sm:$0xf] }
  0xd9   : > { %1227 = vmatpush.bf16.msrb.mxu0 %v2936_v54  ;;  %v3140_v43 = vld [vmem:[%s3845_s29 + $0x2a4] sm:$0xf0]  ;;  %v2649_v45 = vld [vmem:[%s3845_s29 + $0x28] sm:$0xf0]  ;;  %v3075_v46 = vld [vmem:[%s3845_s29 + $0xa4] sm:$0xf]  ;;  %v2904_v48 = vor.u32 %v3124_v40, %v2903_v39 }
  0xda   : > { %1241 = vmatpush.bf16.msrb.mxu1 %v3000_v59  ;;  %v2713_v47 = vld [vmem:[%s3845_s29 + $0xa8] sm:$0xf0]  ;;  %v2968_v49 = vor.u32 %v3140_v43, %v2967_v41  ;;  %v2652_v50 = vor.u32 %v3059_v44, %v2649_v45  ;;  %v2895_v51 = vld [vmem:[%s3845_s29 + $0x210] sm:$0xf]  ;;  %v3122_v52 = vld [vmem:[%s3845_s29 + $0x214] sm:$0xf0] }
  0xdb   : > { %1255 = vmatpush.bf16.msrb.mxu2 %v2684_v60  ;;  %v2959_v53 = vld [vmem:[%s3845_s29 + $0x290] sm:$0xf]  ;;  %v2716_v54 = vor.u32 %v3075_v46, %v2713_v47  ;;  %v3138_v55 = vld [vmem:[%s3845_s29 + $0x294] sm:$0xf0]  ;;  %v3057_v56 = vld [vmem:[%s3845_s29 + $0x14] sm:$0xf]  ;;  %v2896_v61 = vor.u32 %v3122_v52, %v2895_v51 }
  0xdc   : > { %1269 = vmatpush.bf16.msrb.mxu3 %v2748_v0  ;;  %v2641_v57 = vld [vmem:[%s3845_s29 + $0x18] sm:$0xf0]  ;;  %v3073_v59 = vld [vmem:[%s3845_s29 + $0x94] sm:$0xf]  ;;  %v2887_v62 = vld [vmem:[%s3845_s29 + $0x200] sm:$0xf]  ;;  %v2960_v1 = vor.u32 %v3138_v55, %v2959_v53 }
  0xdd   : > { %1228 = vmatpush.bf16.msrb.mxu0 %v2928_v8  ;;  %v2705_v60 = vld [vmem:[%s3845_s29 + $0x98] sm:$0xf0]  ;;  %v3120_v63 = vld [vmem:[%s3845_s29 + $0x204] sm:$0xf0]  ;;  %v2951_v0 = vld [vmem:[%s3845_s29 + $0x280] sm:$0xf]  ;;  %v2644_v2 = vor.u32 %v3057_v56, %v2641_v57 }
  0xde   : > { %1242 = vmatpush.bf16.msrb.mxu1 %v2992_v12  ;;  %v3136_v3 = vld [vmem:[%s3845_s29 + $0x284] sm:$0xf0]  ;;  %v3055_v4 = vld [vmem:[%s3845_s29 + $0x4] sm:$0xf]  ;;  %v2633_v6 = vld [vmem:[%s3845_s29 + $0x8] sm:$0xf0]  ;;  %v2708_v7 = vor.u32 %v3073_v59, %v2705_v60  ;;  %v2888_v15 = vor.u32 %v3120_v63, %v2887_v62 }
  0xdf   : > { %1256 = vmatpush.bf16.msrb.mxu2 %v2676_v13  ;;  %v3071_v8 = vld [vmem:[%s3845_s29 + $0x84] sm:$0xf]  ;;  %v2697_v9 = vld [vmem:[%s3845_s29 + $0x88] sm:$0xf0]  ;;  %v3101_v10 = vld [vmem:[%s3845_s29 + $0x174] sm:$0xf]  ;;  %v2952_v19 = vor.u32 %v3136_v3, %v2951_v0  ;;  %v2636_v20 = vor.u32 %v3055_v4, %v2633_v6 }
  0xe0   : > { %1270 = vmatpush.bf16.msrb.mxu3 %v2740_v17  ;;  %v2817_v12 = vld [vmem:[%s3845_s29 + $0x178] sm:$0xf0]  ;;  %v3117_v13 = vld [vmem:[%s3845_s29 + $0x1f4] sm:$0xf]  ;;  %v2623_v22 = vld [vmem:[%s4571_s10 + $0x10] sm:$0xf] }
  0xe1   : > { %1229 = vmatpush.bf16.msrb.mxu0 %v2920_v24  ;;  %v2881_v14 = vld [vmem:[%s3845_s29 + $0x1f8] sm:$0xf0]  ;;  %v3133_v16 = vld [vmem:[%s3845_s29 + $0x274] sm:$0xf]  ;;  %v3054_v24 = vld [vmem:[%s4571_s10 + $0x24] sm:$0xf0] }
  0xe2   : > { %1243 = vmatpush.bf16.msrb.mxu1 %v2984_v25  ;;  %v2945_v17 = vld [vmem:[%s3845_s29 + $0x278] sm:$0xf0]  ;;  %v3149_v18 = vld [vmem:[%s3845_s29 + $0x2f4] sm:$0xf]  ;;  %v2700_v25 = vor.u32 %v3071_v8, %v2697_v9  ;;  %v3051_v27 = vld [vmem:[%s4571_s10 + $0x14] sm:$0xf]  ;;  %v2884_v29 = vor.u32 %v3117_v13, %v2881_v14  ;;  %v4063_v35 = vor.u32 %v3054_v24, %v2623_v22 }
  0xe3   : > { %1257 = vmatpush.bf16.msrb.mxu2 %v2668_v26  ;;  %v3009_v21 = vld [vmem:[%s3845_s29 + $0x2f8] sm:$0xf0]  ;;  %v2820_v26 = vor.u32 %v3101_v10, %v2817_v12  ;;  %v3099_v31 = vld [vmem:[%s3845_s29 + $0x164] sm:$0xf]  ;;  %v2809_v32 = vld [vmem:[%s3845_s29 + $0x168] sm:$0xf0] }
  0xe4   : > { %1271 = vmatpush.bf16.msrb.mxu3 %v2732_v30  ;;  %v2625_v28 = vld [vmem:[%s4571_s10 + $0x28] sm:$0xf0]  ;;  %v2948_v30 = vor.u32 %v3133_v16, %v2945_v17  ;;  %v3115_v33 = vld [vmem:[%s3845_s29 + $0x1e4] sm:$0xf]  ;;  %v3012_v34 = vor.u32 %v3149_v18, %v3009_v21  ;;  %v3001_v41 = vld [vmem:[%s3845_s29 + $0x2e8] sm:$0xf0] }
  0xe5   : > { %1230 = vmatpush.bf16.msrb.mxu0 %v2912_v36  ;;  %v2873_v36 = vld [vmem:[%s3845_s29 + $0x1e8] sm:$0xf0]  ;;  %v4068_v39 = vor.u32 %v3051_v27, %v2625_v28  ;;  %v3147_v40 = vld [vmem:[%s3845_s29 + $0x2e4] sm:$0xf]  ;;  %v3097_v45 = vld [vmem:[%s3845_s29 + $0x154] sm:$0xf] }
  0xe6   : > { %1244 = vmatpush.bf16.msrb.mxu1 %v2976_v37  ;;  %v3131_v37 = vld [vmem:[%s3845_s29 + $0x264] sm:$0xf]  ;;  %v2876_v43 = vor.u32 %v3115_v33, %v2873_v36  ;;  %v2801_v46 = vld [vmem:[%s3845_s29 + $0x158] sm:$0xf0]  ;;  %v3113_v47 = vld [vmem:[%s3845_s29 + $0x1d4] sm:$0xf] }
  0xe7   : > { %1258 = vmatpush.bf16.msrb.mxu2 %v2660_v38  ;;  %v2937_v38 = vld [vmem:[%s3845_s29 + $0x268] sm:$0xf0]  ;;  %v2929_v51 = vld [vmem:[%s3845_s29 + $0x258] sm:$0xf0]  ;;  %v3145_v52 = vld [vmem:[%s3845_s29 + $0x2d4] sm:$0xf] }
  0xe8   : > { %1272 = vmatpush.bf16.msrb.mxu3 %v2724_v42  ;;  %v2812_v42 = vor.u32 %v3099_v31, %v2809_v32  ;;  %v2940_v44 = vor.u32 %v3131_v37, %v2937_v38  ;;  %v2993_v53 = vld [vmem:[%s3845_s29 + $0x2d8] sm:$0xf0]  ;;  %v3095_v57 = vld [vmem:[%s3845_s29 + $0x144] sm:$0xf]  ;;  %v2793_v59 = vld [vmem:[%s3845_s29 + $0x148] sm:$0xf0] }
  0xe9   : > { %1231 = vmatpush.bf16.msrb.mxu0 %v2904_v48  ;;  %v3004_v48 = vor.u32 %v3147_v40, %v3001_v41  ;;  %v3111_v60 = vld [vmem:[%s3845_s29 + $0x1c4] sm:$0xf]  ;;  %v2921_v63 = vld [vmem:[%s3845_s29 + $0x248] sm:$0xf0]  ;;  %v3093_v4 = vld [vmem:[%s3845_s29 + $0x134] sm:$0xf] }
  0xea   : > { %1245 = vmatpush.bf16.msrb.mxu1 %v2968_v49  ;;  %v2865_v49 = vld [vmem:[%s3845_s29 + $0x1d8] sm:$0xf0]  ;;  %v3127_v62 = vld [vmem:[%s3845_s29 + $0x244] sm:$0xf]  ;;  %v3125_v10 = vld [vmem:[%s3845_s29 + $0x234] sm:$0xf] }
  0xeb   : > { %1259 = vmatpush.bf16.msrb.mxu2 %v2652_v50  ;;  %v3129_v50 = vld [vmem:[%s3845_s29 + $0x254] sm:$0xf]  ;;  %v2868_v55 = vor.u32 %v3113_v47, %v2865_v49  ;;  %v3143_v0 = vld [vmem:[%s3845_s29 + $0x2c4] sm:$0xf]  ;;  %v2924_v3 = vor.u32 %v3127_v62, %v2921_v63  ;;  %v2785_v6 = vld [vmem:[%s3845_s29 + $0x138] sm:$0xf0] }
  0xec   : > { %1273 = vmatpush.bf16.msrb.mxu3 %v2716_v54  ;;  %v2804_v54 = vor.u32 %v3097_v45, %v2801_v46  ;;  %v2932_v56 = vor.u32 %v3129_v50, %v2929_v51  ;;  %v2849_v9 = vld [vmem:[%s3845_s29 + $0x1b8] sm:$0xf0]  ;;  %v3141_v13 = vld [vmem:[%s3845_s29 + $0x2b4] sm:$0xf]  ;;  %v3091_v18 = vld [vmem:[%s3845_s29 + $0x124] sm:$0xf] }
  0xed   : > { %1232 = vmatpush.bf16.msrb.mxu0 %v2896_v61  ;;  %v2857_v61 = vld [vmem:[%s3845_s29 + $0x1c8] sm:$0xf0]  ;;  %v2913_v12 = vld [vmem:[%s3845_s29 + $0x238] sm:$0xf0]  ;;  %v3123_v24 = vld [vmem:[%s3845_s29 + $0x224] sm:$0xf] }
  0xee   : > { %1246 = vmatpush.bf16.msrb.mxu1 %v2960_v1  ;;  %v2796_v1 = vor.u32 %v3095_v57, %v2793_v59  ;;  %v2977_v14 = vld [vmem:[%s3845_s29 + $0x2b8] sm:$0xf0]  ;;  %v2916_v17 = vor.u32 %v3125_v10, %v2913_v12  ;;  %v2841_v22 = vld [vmem:[%s3845_s29 + $0x1a8] sm:$0xf0]  ;;  %v3089_v31 = vld [vmem:[%s3845_s29 + $0x114] sm:$0xf] }
  0xef   : > { %1260 = vmatpush.bf16.msrb.mxu2 %v2644_v2  ;;  %v2860_v2 = vor.u32 %v3111_v60, %v2857_v61  ;;  %v2980_v21 = vor.u32 %v3141_v13, %v2977_v14  ;;  %v2969_v27 = vld [vmem:[%s3845_s29 + $0x2a8] sm:$0xf0]  ;;  %v2769_v32 = vld [vmem:[%s3845_s29 + $0x118] sm:$0xf0]  ;;  %v3105_v33 = vld [vmem:[%s3845_s29 + $0x194] sm:$0xf] }
  0xf0   : > { %1274 = vmatpush.bf16.msrb.mxu3 %v2708_v7  ;;  %v3109_v7 = vld [vmem:[%s3845_s29 + $0x1b4] sm:$0xf]  ;;  %v2833_v36 = vld [vmem:[%s3845_s29 + $0x198] sm:$0xf0]  ;;  %v3087_v45 = vld [vmem:[%s3845_s29 + $0x104] sm:$0xf] }
  0xf1   : > { %1233 = vmatpush.bf16.msrb.mxu0 %v2888_v15  ;;  %v2788_v15 = vor.u32 %v3093_v4, %v2785_v6  ;;  %v2852_v16 = vor.u32 %v3109_v7, %v2849_v9  ;;  %v3121_v37 = vld [vmem:[%s3845_s29 + $0x214] sm:$0xf]  ;;  %v2897_v38 = vld [vmem:[%s3845_s29 + $0x218] sm:$0xf0]  ;;  %v2761_v46 = vld [vmem:[%s3845_s29 + $0x108] sm:$0xf0] }
  0xf2   : > { %1247 = vmatpush.bf16.msrb.mxu1 %v2952_v19  ;;  %v2777_v19 = vld [vmem:[%s3845_s29 + $0x128] sm:$0xf0]  ;;  %v3137_v40 = vld [vmem:[%s3845_s29 + $0x294] sm:$0xf]  ;;  %v2961_v41 = vld [vmem:[%s3845_s29 + $0x298] sm:$0xf0] }
  0xf3   : > { %1261 = vmatpush.bf16.msrb.mxu2 %v2636_v20  ;;  %v3107_v20 = vld [vmem:[%s3845_s29 + $0x1a4] sm:$0xf]  ;;  %v2780_v28 = vor.u32 %v3091_v18, %v2777_v19  ;;  %v2825_v49 = vld [vmem:[%s3845_s29 + $0x188] sm:$0xf0]  ;;  %v4125_v59 = vld [vmem:[%s3861_s18 + $0x70] sm:$0xff]  ;;  %v3589_v6 = vmov 0.0  }
  0xf4   : > { %1275 = vmatpush.bf16.msrb.mxu3 %v2700_v25  ;;  %1234 = vmatmul.bf16.vlgmr.msrb.gmra.mxu0 %v4063_v35  ;;  %v2905_v25 = vld [vmem:[%s3845_s29 + $0x228] sm:$0xf0]  ;;  %v3103_v47 = vld [vmem:[%s3845_s29 + $0x184] sm:$0xf]  ;;  %v4128_v60 = vld [vmem:[%s3861_s18 + $0x78] sm:$0xff]  ;;  %vm1405_vm11 = vcmask 523264  }
  0xf5   : > { %1282 = vmatpush.bf16.msra.mxu0 %v2820_v26  ;;  %1248 = vmatmul.bf16.vlgmr.msrb.gmra.mxu1 %v4068_v39  ;;  %v3139_v26 = vld [vmem:[%s3845_s29 + $0x2a4] sm:$0xf]  ;;  %v2889_v51 = vld [vmem:[%s3845_s29 + $0x208] sm:$0xf0]  ;;  %v4142_v62 = vld [vmem:[%s3861_s18 + $0x50] sm:$0xff]  ;;  %p548_p7 = scmp.lt.s32.totalorder %s4570_s16, 4 }
  0xf6   : > { %1296 = vmatpush.bf16.msra.mxu1 %v2884_v29  ;;  %1262 = vmatmul.bf16.vlgmr.msrb.gmra.mxu2 %v3965_v58  ;;  %v2996_v58 = vor.u32 %v3145_v52, %v2993_v53  ;;  %v2844_v29 = vor.u32 %v3107_v20, %v2841_v22  ;;  %v3119_v50 = vld [vmem:[%s3845_s29 + $0x204] sm:$0xf]  ;;  %v2953_v53 = vld [vmem:[%s3845_s29 + $0x288] sm:$0xf0]  ;;  %v4147_v63 = vld [vmem:[%s3861_s18 + $0x58] sm:$0xff]  ;;  %s4576_s30 = sld [smem:[#allocation28_spill]] }
  0xf7   : > { %1310 = vmatpush.bf16.msra.mxu2 %v2948_v30  ;;  %1276 = vmatmul.bf16.vlgmr.msrb.gmra.mxu3 %v3979_v5  ;;  %v2985_v5 = vld [vmem:[%s3845_s29 + $0x2c8] sm:$0xf0]  ;;  %v2908_v30 = vor.u32 %v3123_v24, %v2905_v25  ;;  %v3135_v52 = vld [vmem:[%s3845_s29 + $0x284] sm:$0xf]  ;;  %v654_v7 = vld [vmem:[%s3853_s22] sm:$0x3] }
  0xf8   : > { %1324 = vmatpush.bf16.msra.mxu3 %v3012_v34  ;;  %v2988_v8 = vor.u32 %v3143_v0, %v2985_v5  ;;  %v2972_v34 = vor.u32 %v3139_v26, %v2969_v27  ;;  %v2956_v57 = vor.u32 %v3135_v52, %v2953_v53  ;;  %v4137_v61 = vld [vmem:[%s3861_s18 + $0x68] sm:$0xff]  ;;  %v4150_v0 = vld [vmem:[%s3861_s18 + $0x40] sm:$0xff]  ;;  %v656_v9 = vperm.slane %v654_v7, 0  ;;  %s3590_s29 = smov 64   ;;  %s487_s22 = scalar_lea.vmem [#allocation13], %s3841_s12 }
  0xf9   : > { %1283 = vmatpush.bf16.msra.mxu0 %v2812_v42  ;;  %v2772_v42 = vor.u32 %v3089_v31, %v2769_v32  ;;  %v4176_v5 = vld [vmem:[%s3861_s18 + $0x28] sm:$0xff]  ;;  %v1342_v31 = vlaneseq  ;;  %v657_v53 = vperm.slane %v654_v7, 1  ;;  %s4582_s16 = smov (!%p548_p7, %s4570_s16), 4 }
  0xfa   : > { %1297 = vmatpush.bf16.msra.mxu1 %v2876_v43  ;;  %v2836_v43 = vor.u32 %v3105_v33, %v2833_v36  ;;  %v4196_v4 = vld [vmem:[%s3861_s18 + $0x8] sm:$0xff] }
  0xfb   : > { %1311 = vmatpush.bf16.msra.mxu2 %v2940_v44  ;;  %v2900_v44 = vor.u32 %v3121_v37, %v2897_v38  ;;  %v1343_v36 = vand.u32 127, %v1342_v31 }
  0xfc   : > { %1325 = vmatpush.bf16.msra.mxu3 %v3004_v48  ;;  %v2964_v48 = vor.u32 %v3137_v40, %v2961_v41 }
  0xfd   : > { %1284 = vmatpush.bf16.msra.mxu0 %v2804_v54  ;;  %v2764_v54 = vor.u32 %v3087_v45, %v2761_v46  ;;  %v1349_v38 = vand.u32 63, %v1343_v36 }
  0xfe   : > { %1298 = vmatpush.bf16.msra.mxu1 %v2868_v55  ;;  %v2828_v55 = vor.u32 %v3103_v47, %v2825_v49 }
  0xff   : > { %1312 = vmatpush.bf16.msra.mxu2 %v2932_v56  ;;  %v2892_v56 = vor.u32 %v3119_v50, %v2889_v51  ;;  %vm4266_vm0 = vcmp.lt.s32.totalorder %v1349_v38, 32  ;;  %v4297_v38 = vadd.s32 128, %v1343_v36 }
 0x100   : > { %1326 = vmatpush.bf16.msra.mxu3 %v2996_v58  ;;  %v4132_v58 = vld [vmem:[%s3861_s18 + $0x60] sm:$0xff] }
 0x101   : > { %1285 = vmatpush.bf16.msra.mxu0 %v2796_v1  ;;  %v4180_v1 = vld [vmem:[%s3861_s18 + $0x10] sm:$0xff]  ;;  %vm1374_vm7 = vcmp.lt.s32.totalorder %v4297_v38, 192 }
 0x102   : > { %1299 = vmatpush.bf16.msra.mxu1 %v2860_v2  ;;  %v4186_v2 = vld [vmem:[%s3861_s18 + $0x18] sm:$0xff] }
 0x103   : > { %1313 = vmatpush.bf16.msra.mxu2 %v2924_v3  ;;  %v4190_v3 = vld [vmem:[%s3861_s18] sm:$0xff] }
 0x104   : > { %1327 = vmatpush.bf16.msra.mxu3 %v2988_v8 }
 0x105   : > { %1286 = vmatpush.bf16.msra.mxu0 %v2788_v15 }
 0x106   : > { %1300 = vmatpush.bf16.msra.mxu1 %v2852_v16 }
 0x107   : > { %1314 = vmatpush.bf16.msra.mxu2 %v2916_v17 }
 0x108   : > { %1328 = vmatpush.bf16.msra.mxu3 %v2980_v21 }
 0x109   : > { %1287 = vmatpush.bf16.msra.mxu0 %v2780_v28 }
 0x10a   : > { %1301 = vmatpush.bf16.msra.mxu1 %v2844_v29 }
 0x10b   : > { %1315 = vmatpush.bf16.msra.mxu2 %v2908_v30 }
 0x10c   : > { %1329 = vmatpush.bf16.msra.mxu3 %v2972_v34 }
 0x10d   : > { %1288 = vmatpush.bf16.msra.mxu0 %v2772_v42 }
 0x10e   : > { %1302 = vmatpush.bf16.msra.mxu1 %v2836_v43 }
 0x10f   : > { %1316 = vmatpush.bf16.msra.mxu2 %v2900_v44 }
 0x110   : > { %1330 = vmatpush.bf16.msra.mxu3 %v2964_v48 }
 0x111   : > { %1289 = vmatpush.bf16.msra.mxu0 %v2764_v54 }
 0x112   : > { %1303 = vmatpush.bf16.msra.mxu1 %v2828_v55 }
 0x113   : > { %1317 = vmatpush.bf16.msra.mxu2 %v2892_v56 }
 0x114   : > { %1331 = vmatpush.bf16.msra.mxu3 %v2956_v57  ;;  %1290 = vmatmul.bf16.vlgmr.msra.gmra.mxu0 %v3989_v11  ;;  %v4156_v11 = vld [vmem:[%s3861_s18 + $0x48] sm:$0xff] }
 0x115   : > { %1417 = vmatpush.msrb.mxu0 %v4125_v59  ;;  %1304 = vmatmul.bf16.vlgmr.msra.gmra.mxu1 %v4005_v23  ;;  %v4160_v23 = vld [vmem:[%s3861_s18 + $0x30] sm:$0xff] }
 0x116   : > { %1318 = vmatmul.bf16.vlgmr.msra.gmra.mxu2 %v4063_v35  ;;  %1667 = vmatpush.msrb.mxu1 %v4128_v60  ;;  %v4166_v35 = vld [vmem:[%s3861_s18 + $0x38] sm:$0xff] }
 0x117   : > { %1437 = vmatpush.msrb.mxu2 %v4128_v60  ;;  %1332 = vmatmul.bf16.vlgmr.msra.gmra.mxu3 %v4068_v39  ;;  %v4170_v39 = vld [vmem:[%s3861_s18 + $0x20] sm:$0xff]  ;;  %s2604_s18 = sshll.u32 %s4582_s16, 1 }
 0x118   : > { %1418 = vmatpush.msrb.mxu0 %v4132_v58  ;;  %1547 = vmatpush.msrb.mxu3 %v4128_v60  ;;  %s551_s15 = scalar_lea.vmem %s4576_s30, %s2604_s18 }
 0x119   : > { %1438 = vmatpush.msrb.mxu2 %v4137_v61  ;;  %1668 = vmatpush.msrb.mxu1 %v4137_v61 }
 0x11a   : > { %1419 = vmatpush.msrb.mxu0 %v4142_v62  ;;  %1548 = vmatpush.msrb.mxu3 %v4137_v61 }
 0x11b   : > { %1439 = vmatpush.msrb.mxu2 %v4147_v63  ;;  %1669 = vmatpush.msrb.mxu1 %v4147_v63 }
 0x11c   : > { %1420 = vmatpush.msrb.mxu0 %v4150_v0  ;;  %1549 = vmatpush.msrb.mxu3 %v4147_v63 }
 0x11d   : > { %1440 = vmatpush.msrb.mxu2 %v4156_v11  ;;  %1670 = vmatpush.msrb.mxu1 %v4156_v11 }
 0x11e   : > { %1421 = vmatpush.msrb.mxu0 %v4160_v23  ;;  %1550 = vmatpush.msrb.mxu3 %v4156_v11 }
 0x11f   : > { %1441 = vmatpush.msrb.mxu2 %v4166_v35  ;;  %1671 = vmatpush.msrb.mxu1 %v4166_v35 }
 0x120   : > { %1422 = vmatpush.msrb.mxu0 %v4170_v39  ;;  %1551 = vmatpush.msrb.mxu3 %v4166_v35 }
 0x121   : > { %1442 = vmatpush.msrb.mxu2 %v4176_v5  ;;  %1672 = vmatpush.msrb.mxu1 %v4176_v5 }
 0x122   : > { %1423 = vmatpush.msrb.mxu0 %v4180_v1  ;;  %1552 = vmatpush.msrb.mxu3 %v4176_v5 }
 0x123   : > { %1443 = vmatpush.msrb.mxu2 %v4186_v2  ;;  %1673 = vmatpush.msrb.mxu1 %v4186_v2 }
 0x124   : > { %1424 = vmatpush.msrb.mxu0 %v4190_v3  ;;  %1553 = vmatpush.msrb.mxu3 %v4186_v2 }
 0x125   : > { %1444 = vmatpush.msrb.mxu2 %v4196_v4  ;;  %1425 = vmatmul.f32.vlgmr.msrb.gmra.mxu0 %v3589_v6 }
 0x126   : > { %1445 = vmatmul.f32.vlgmr.msrb.gmra.mxu2 %v3589_v6  ;;  %1554 = vmatpush.msrb.mxu3 %v4196_v4 }
 0x127   : > { %1527 = vmatpush.msra.mxu2 %v4125_v59  ;;  %1647 = vmatpush.msra.mxu0 %v4125_v59 }
 0x128   : > { %1787 = vmatpush.msra.mxu3 %v4128_v60  ;;  %1674 = vmatpush.msrb.mxu1 %v4196_v4 }
 0x129   : > { %1528 = vmatpush.msra.mxu2 %v4132_v58  ;;  %1648 = vmatpush.msra.mxu0 %v4132_v58 }
 0x12a   : > { %1788 = vmatpush.msra.mxu3 %v4137_v61  ;;  %1903 = vmatpush.msra.mxu1 %v4128_v60 }
 0x12b   : > { %1529 = vmatpush.msra.mxu2 %v4142_v62  ;;  %1649 = vmatpush.msra.mxu0 %v4142_v62 }
 0x12c   : > { %1789 = vmatpush.msra.mxu3 %v4147_v63  ;;  %1904 = vmatpush.msra.mxu1 %v4137_v61 }
 0x12d   : > { %1530 = vmatpush.msra.mxu2 %v4150_v0  ;;  %1650 = vmatpush.msra.mxu0 %v4150_v0 }
 0x12e   : > { %1790 = vmatpush.msra.mxu3 %v4156_v11  ;;  %1905 = vmatpush.msra.mxu1 %v4147_v63 }
 0x12f   : > { %1531 = vmatpush.msra.mxu2 %v4160_v23  ;;  %1651 = vmatpush.msra.mxu0 %v4160_v23 }
 0x130   : > { %1791 = vmatpush.msra.mxu3 %v4166_v35  ;;  %1906 = vmatpush.msra.mxu1 %v4156_v11 }
 0x131   : > { %1532 = vmatpush.msra.mxu2 %v4170_v39  ;;  %1652 = vmatpush.msra.mxu0 %v4170_v39 }
 0x132   : > { %1792 = vmatpush.msra.mxu3 %v4176_v5  ;;  %1907 = vmatpush.msra.mxu1 %v4166_v35 }
 0x133   : > { %1533 = vmatpush.msra.mxu2 %v4180_v1  ;;  %1653 = vmatpush.msra.mxu0 %v4180_v1 }
 0x134   : > { %1793 = vmatpush.msra.mxu3 %v4186_v2  ;;  %1908 = vmatpush.msra.mxu1 %v4176_v5 }
 0x135   : > { %1534 = vmatpush.msra.mxu2 %v4190_v3  ;;  %1654 = vmatpush.msra.mxu0 %v4190_v3 }
 0x136   : > { %1794 = vmatpush.msra.mxu3 %v4196_v4  ;;  %1909 = vmatpush.msra.mxu1 %v4186_v2 }
 0x137   : > { %1767 = vmatpush.msrb.mxu2 %v4125_v59  ;;  %1883 = vmatpush.msrb.mxu0 %v4125_v59 }
 0x138   : > { %1910 = vmatpush.msra.mxu1 %v4196_v4 }
 0x139   : > { %1768 = vmatpush.msrb.mxu2 %v4132_v58  ;;  %1884 = vmatpush.msrb.mxu0 %v4132_v58 }
 0x13b   : > { %1769 = vmatpush.msrb.mxu2 %v4142_v62  ;;  %1885 = vmatpush.msrb.mxu0 %v4142_v62 }
 0x13d   : > { %1770 = vmatpush.msrb.mxu2 %v4150_v0  ;;  %1886 = vmatpush.msrb.mxu0 %v4150_v0 }
 0x13f   : > { %1771 = vmatpush.msrb.mxu2 %v4160_v23  ;;  %1887 = vmatpush.msrb.mxu0 %v4160_v23 }
 0x141   : > { %1772 = vmatpush.msrb.mxu2 %v4170_v39  ;;  %1888 = vmatpush.msrb.mxu0 %v4170_v39 }
 0x143   : > { %1773 = vmatpush.msrb.mxu2 %v4180_v1  ;;  %1889 = vmatpush.msrb.mxu0 %v4180_v1 }
 0x145   : > { %1774 = vmatpush.msrb.mxu2 %v4190_v3  ;;  %1890 = vmatpush.msrb.mxu0 %v4190_v3 }
 0x151   : > { %v1179_v8 = vpop.f32.mrf.mxu0 }
 0x152   : > { %v1193_v10 = vpop.f32.mrf.mxu1  ;;  %v1180_v12 = vadd.f32 %v1179_v8, %v656_v9 }
 0x154   : > { %v1194_v14 = vadd.f32 %v1193_v10, %v1180_v12 }
 0x159   : > { %v1207_v13 = vpop.f32.mrf.mxu2  ;;  %v1181_v15 = vpop.f32.mrf.mxu0 }
 0x15a   : > { %v1195_v16 = vpop.f32.mrf.mxu1  ;;  %v1221_v17 = vpop.f32.mrf.mxu3  ;;  %v1182_v18 = vadd.f32 %v1181_v15, %v656_v9  ;;  %v1208_v19 = vadd.f32 %v1207_v13, %v1194_v14 }
 0x15c   : > { %v1196_v20 = vadd.f32 %v1195_v16, %v1182_v18  ;;  %v1222_v21 = vadd.f32 %v1221_v17, %v1208_v19 }
 0x161   : > { %v1209_v22 = vpop.f32.mrf.mxu2 }
 0x162   : > { %v1210_v27 = vadd.f32 %v1209_v22, %v1196_v20  ;;  %v1223_v28 = vpop.f32.mrf.mxu3 }
 0x164   : > { %v1224_v30 = vadd.f32 %v1223_v28, %v1210_v27 }
 0x171   : > { %v1235_v24 = vpop.f32.mrf.mxu0 }
 0x172   : > { %v1236_v25 = vadd.f32 %v1235_v24, %v1222_v21  ;;  %v1249_v26 = vpop.f32.mrf.mxu1 }
 0x174   : > { %v1250_v29 = vadd.f32 %v1249_v26, %v1236_v25 }
 0x176   : > { %1338 = vst [vmem:[#allocation2 + $0x10] sm:$0xff] %v1250_v29 }
 0x179   : > { %v1237_v32 = vpop.f32.mrf.mxu0  ;;  %v1263_v44 = vpop.f32.mrf.mxu2 }
 0x17a   : > { %v1238_v33 = vadd.f32 %v1237_v32, %v1224_v30  ;;  %v1251_v34 = vpop.f32.mrf.mxu1  ;;  %v1277_v48 = vpop.f32.mrf.mxu3  ;;  %v1264_v8 = vadd.f32 %v1263_v44, %v657_v53 }
 0x17c   : > { %v1252_v37 = vadd.f32 %v1251_v34, %v1238_v33  ;;  %v1278_v10 = vadd.f32 %v1277_v48, %v1264_v8 }
 0x17d   : > { %v4257_v40 = vld [vmem:[#allocation2 + $0x10] sm:$0xc]  ;;  %v4259_v41 = vld [vmem:[#allocation2 + $0x10] sm:$0x30]  ;;  %v4261_v42 = vld [vmem:[#allocation2 + $0x10] sm:$0xc0] }
 0x17e   : > { %1340 = vst [vmem:[#allocation2 + $0x18] sm:$0xff] %v1252_v37  ;;  %v1393_v43 = vld [vmem:[#allocation2 + $0x10] sm:$0x3]  ;;  %v2088_v45 = vrot.slane %v4257_v40, 6  ;;  %v1973_v46 = vrot.slane %v4259_v41, 2  ;;  %v1863_v47 = vrot.slane %v4261_v42, 6 }
 0x17f   : > { %v2204_v50 = vrot.slane %v1393_v43, 2 }
 0x181   : > { %v1265_v9 = vpop.f32.mrf.mxu2 }
 0x182   : > { %v1279_v12 = vpop.f32.mrf.mxu3  ;;  %v1266_v16 = vadd.f32 %v1265_v9, %v657_v53 }
 0x184   : > { %v1280_v19 = vadd.f32 %v1279_v12, %v1266_v16 }
 0x185   : > { %v4270_v51 = vld [vmem:[#allocation2 + $0x18] sm:$0x30]  ;;  %v4272_v52 = vld [vmem:[#allocation2 + $0x18] sm:$0xc]  ;;  %v1395_v54 = vld [vmem:[#allocation2 + $0x18] sm:$0xc0] }
 0x186   : > { %v4274_v55 = vld [vmem:[#allocation2 + $0x18] sm:$0x3]  ;;  %v4284_v57 = vsel %vm4266_vm0, %v4272_v52, %v1973_v46  ;;  %v4289_v6 = vsel %vm4266_vm0, %v4270_v51, %v2088_v45  ;;  %v4293_v7 = vsel %vm4266_vm0, %v1395_v54, %v2204_v50  ;;  %v1399_v26 = vrot.slane %v1395_v54, 6 }
 0x187   : > { %v4279_v56 = vsel %vm4266_vm0, %v4274_v55, %v1863_v47  ;;  %v1356_v45 = vand.u32 63, %v4297_v38  ;;  %v2319_v38 = vld [vmem:[%s3863_s11 + $0x8] sm:$0xff] }
 0x188   : > { %v1403_v31 = vsel %vm4266_vm0, %v1393_v43, %v1399_v26 }
 0x189   : > { %vm4306_vm1 = vcmp.lt.s32.totalorder %v1356_v45, 32 }
 0x191   : > { %v1291_v13 = vpop.f32.mrf.mxu0 }
 0x192   : > { %v1292_v14 = vadd.f32 %v1291_v13, %v1278_v10  ;;  %v1305_v15 = vpop.f32.mrf.mxu1 }
 0x194   : > { %v1306_v17 = vadd.f32 %v1305_v15, %v1292_v14 }
 0x199   : > { %v1319_v18 = vpop.f32.mrf.mxu2  ;;  %v1293_v22 = vpop.f32.mrf.mxu0 }
 0x19a   : > { %v1320_v20 = vadd.f32 %v1319_v18, %v1306_v17  ;;  %v1333_v21 = vpop.f32.mrf.mxu3  ;;  %v1294_v25 = vadd.f32 %v1293_v22, %v1280_v19  ;;  %v1307_v27 = vpop.f32.mrf.mxu1 }
 0x19c   : > { %v1334_v24 = vadd.f32 %v1333_v21, %v1320_v20  ;;  %v1308_v28 = vadd.f32 %v1307_v27, %v1294_v25 }
 0x19e   : > { %1339 = vst [vmem:[#allocation2] sm:$0xff] %v1334_v24 }
 0x1a1   : > { %v1321_v29 = vpop.f32.mrf.mxu2 }
 0x1a2   : > { %v1322_v30 = vadd.f32 %v1321_v29, %v1308_v28  ;;  %v1426_v32 = vpop.f32.mrf.mxu0  ;;  %v1335_v33 = vpop.f32.mrf.mxu3 }
 0x1a3   : > { %v1449_v34 = vadd.f32 %v1426_v32, %v1403_v31 }
 0x1a4   : > { %v1336_v37 = vadd.f32 %v1335_v33, %v1322_v30 }
 0x1a5   : > { %v3013_v44 = vmul.f32 -1.442695, %v1449_v34  ;;  %v4300_v46 = vld [vmem:[#allocation2] sm:$0xc]  ;;  %v4302_v47 = vld [vmem:[#allocation2] sm:$0x30] }
 0x1a6   : > { %1341 = vst [vmem:[#allocation2 + $0x8] sm:$0xff] %v1336_v37  ;;  %v4304_v48 = vld [vmem:[#allocation2] sm:$0xc0]  ;;  %v1394_v43 = vld [vmem:[#allocation2] sm:$0x3]  ;;  %v2089_v53 = vrot.slane %v4300_v46, 6 }
 0x1a7   : > { %3231 = vpow2.f32 %v3013_v44  ;;  %v1974_v36 = vrot.slane %v4302_v47, 2  ;;  %v1864_v54 = vrot.slane %v4304_v48, 6  ;;  %v2205_v21 = vrot.slane %v1394_v43, 2 }
 0x1a9   : > { %v1446_v14 = vpop.f32.mrf.mxu2 }
 0x1ad   : > { %v3232_v8 = vpop.eup %3231  ;;  %v1396_v9 = vld [vmem:[#allocation2 + $0x8] sm:$0xc0]  ;;  %v4313_v10 = vld [vmem:[#allocation2 + $0x8] sm:$0x30]  ;;  %v4315_v12 = vld [vmem:[#allocation2 + $0x8] sm:$0xc] }
 0x1ae   : > { %v1400_v13 = vrot.slane %v1396_v9, 6  ;;  %v4317_v15 = vld [vmem:[#allocation2 + $0x8] sm:$0x3]  ;;  %v1459_v16 = vadd.f32 1.0, %v3232_v8  ;;  %v4327_v18 = vsel %vm4306_vm1, %v4315_v12, %v1974_v36  ;;  %v4332_v19 = vsel %vm4306_vm1, %v4313_v10, %v2089_v53 }
 0x1af   : > { %v4322_v17 = vsel %vm4306_vm1, %v4317_v15, %v1864_v54  ;;  %v4338_v24 = vsel %vm4306_vm1, %v1396_v9, %v2205_v21 }
 0x1b0   : > { %v1404_v20 = vsel %vm4306_vm1, %v1394_v43, %v1400_v13  ;;  %3233 = vrcp.f32 %v1459_v16  ;;  %v1472_v45 = vand.u32 2147483648, %v1459_v16  ;;  %vm1466_vm4 = vweird.f32 %v1459_v16 }
 0x1b1   : > { %v1450_v22 = vadd.f32 %v1446_v14, %v1404_v20  ;;  %v1470_v36 = vand.u32 2147483647, %v1459_v16 }
 0x1b2   : > { %v1473_v13 = vor.u32 1.1754944e-38, %v1472_v45 }
 0x1b3   : > { %v3014_v25 = vmul.f32 -1.442695, %v1450_v22  ;;  %vm1471_vm10 = vcmp.eq.f32.partialorder %v1470_v36, 8.507059e+37 }
 0x1b5   : > { %3235 = vpow2.f32 %v3014_v25 }
 0x1b6   : > { %v3234_v26 = vpop.eup %3233 }
 0x1b7   : > { %v1462_v29 = vmul.f32 %v3234_v26, %v1459_v16  ;;  %vm1467_vm2 = vweird.f32 %v3234_v26 }
 0x1b8   : > { %vm1468_vm5 = vmor %vm1466_vm4, %vm1467_vm2 }
 0x1b9   : > { %v1463_v30 = vsub.f32 1.0, %v1462_v29 }
 0x1bb   : > { %v3236_v27 = vpop.eup %3235  ;;  %v1464_v32 = vmul.f32 %v3234_v26, %v1463_v30 }
 0x1bc   : > { %v1460_v28 = vadd.f32 1.0, %v3236_v27 }
 0x1bd   : > { %v1465_v37 = vadd.f32 %v3234_v26, %v1464_v32  ;;  %v1508_v32 = vrot.slane %v4270_v51, 2 }
 0x1be   : > { %3237 = vrcp.f32 %v1460_v28  ;;  %v1487_v44 = vand.u32 2147483648, %v1460_v28  ;;  %v1485_v53 = vand.u32 2147483647, %v1460_v28  ;;  %vm1481_vm6 = vweird.f32 %v1460_v28 }
 0x1bf   : > { %3239 = vtanh.f32 %v1450_v22  ;;  %v1469_v8 = vsel %vm1468_vm5, %v3234_v26, %v1465_v37 }
 0x1c0   : > { %v1488_v9 = vor.u32 1.1754944e-38, %v1487_v44  ;;  %vm1486_vm9 = vcmp.eq.f32.partialorder %v1485_v53, 8.507059e+37  ;;  %v1474_v22 = vsel %vm1471_vm10, %v1473_v13, %v1469_v8 }
 0x1c1   : > { %v1493_v16 = vmul.f32 0.0, %v1474_v22 }
 0x1c4   : > { %v3238_v31 = vpop.eup %3237 }
 0x1c5   : > { %v1477_v33 = vmul.f32 %v3238_v31, %v1460_v28  ;;  %vm1482_vm3 = vweird.f32 %v3238_v31  ;;  %v3240_v20 = vpop.eup %3239 }
 0x1c6   : > { %vm1483_vm8 = vmor %vm1481_vm6, %vm1482_vm3 }
 0x1c7   : > { %v1478_v34 = vsub.f32 1.0, %v1477_v33  ;;  %v1509_v33 = vrot.slane %v4313_v10, 2 }
 0x1c9   : > { %v1479_v43 = vmul.f32 %v3238_v31, %v1478_v34  ;;  %v1513_v53 = vsel %vm4306_vm1, %v4300_v46, %v1509_v33 }
 0x1cb   : > { %v1480_v54 = vadd.f32 %v3238_v31, %v1479_v43  ;;  %v1512_v43 = vsel %vm4266_vm0, %v4257_v40, %v1508_v32 }
 0x1cd   : > { %v1484_v14 = vsel %vm1483_vm8, %v3238_v31, %v1480_v54 }
 0x1ce   : > { %v1489_v21 = vsel %vm1486_vm9, %v1488_v9, %v1484_v14 }
 0x1cf   : > { %v1492_v25 = vsel %vm1374_vm7, %v3240_v20, %v1489_v21 }
 0x1d0   : > { %v1494_v27 = vmul.f32 %v1492_v25, %v1474_v22 }
 0x1d2   : > { %1496 = vrot.lane.b32.xlu0 %v1494_v27, %s3590_s29 }
 0x244   : > { %v1497_v28 = vpop.permute.xlu0 %1496 }
 0x245   : > { %v4344_v29 = vadd.f32 %v1497_v28, %v1493_v16 }
 0x247   : > { %3241 = vtanh.f32 %v4344_v29 }
 0x24d   : > { %v3242_v26 = vpop.eup %3241 }
 0x24e   : > { %v1501_v30 = vmul.f32 %v3242_v26, %v1492_v25 }
 0x250   : > { %1515 = vrot.lane.b32.xlu0 %v1501_v30, %s3590_s29 }
 0x2c2   : > { %v1516_v31 = vpop.permute.xlu0 %1515 }
 0x2c3   : > { %3015 = vmatmul.msk.f32.vlgmr.msra.gmra.mxu2 %vm1405_vm11, %v1516_v31  ;;  %3016 = vmatmul.msk.f32.vlgmr.msrb.gmra.mxu3 %vm1405_vm11, %v1516_v31 }
 0x2c4   : > { %1992 = vmatpush.msra.mxu2 %v4125_v59  ;;  %2012 = vmatpush.msrb.mxu3 %v4128_v60 }
 0x2c6   : > { %1993 = vmatpush.msra.mxu2 %v4132_v58  ;;  %2013 = vmatpush.msrb.mxu3 %v4137_v61 }
 0x2c8   : > { %1994 = vmatpush.msra.mxu2 %v4142_v62  ;;  %2014 = vmatpush.msrb.mxu3 %v4147_v63 }
 0x2ca   : > { %1995 = vmatpush.msra.mxu2 %v4150_v0  ;;  %2015 = vmatpush.msrb.mxu3 %v4156_v11 }
 0x2cc   : > { %1996 = vmatpush.msra.mxu2 %v4160_v23  ;;  %2016 = vmatpush.msrb.mxu3 %v4166_v35 }
 0x2ce   : > { %1997 = vmatpush.msra.mxu2 %v4170_v39  ;;  %2017 = vmatpush.msrb.mxu3 %v4176_v5 }
 0x2d0   : > { %1998 = vmatpush.msra.mxu2 %v4180_v1  ;;  %2018 = vmatpush.msrb.mxu3 %v4186_v2 }
 0x2d2   : > { %1999 = vmatpush.msra.mxu2 %v4190_v3  ;;  %2019 = vmatpush.msrb.mxu3 %v4196_v4 }
 0x346   : > { %v1536_v34 = vpop.f32.mrf.mxu2  ;;  %v1556_v37 = vpop.f32.mrf.mxu3 }
 0x347   : > { %v1561_v44 = vrot.slane %v1536_v34, 6  ;;  %v1562_v45 = vrot.slane %v1556_v37, 6  ;;  %v1610_v37 = vrot.slane %v4344_v29, 6 }
 0x349   : > { %v1565_v36 = vadd.f32 %v1561_v44, %v1512_v43  ;;  %v1566_v54 = vadd.f32 %v1562_v45, %v1513_v53 }
 0x34b   : > { %v3017_v8 = vmul.f32 -1.442695, %v1565_v36  ;;  %v3018_v9 = vmul.f32 -1.442695, %v1566_v54 }
 0x34d   : > { %3243 = vpow2.f32 %v3017_v8 }
 0x34e   : > { %3245 = vpow2.f32 %v3018_v9 }
 0x353   : > { %v3244_v51 = vpop.eup %3243 }
 0x354   : > { %v3246_v10 = vpop.eup %3245  ;;  %v1575_v13 = vadd.f32 1.0, %v3244_v51 }
 0x355   : > { %v1576_v14 = vadd.f32 1.0, %v3246_v10 }
 0x356   : > { %3247 = vrcp.f32 %v1575_v13  ;;  %v1588_v27 = vand.u32 2147483648, %v1575_v13  ;;  %v1586_v28 = vand.u32 2147483647, %v1575_v13  ;;  %vm1582_vm14 = vweird.f32 %v1575_v13 }
 0x357   : > { %3249 = vrcp.f32 %v1576_v14  ;;  %v1603_v26 = vand.u32 2147483648, %v1576_v14  ;;  %v1601_v31 = vand.u32 2147483647, %v1576_v14  ;;  %vm1597_vm2 = vweird.f32 %v1576_v14 }
 0x358   : > { %3251 = vtanh.f32 %v1566_v54  ;;  %v1589_v33 = vor.u32 1.1754944e-38, %v1588_v27  ;;  %vm1587_vm3 = vcmp.eq.f32.partialorder %v1586_v28, 8.507059e+37 }
 0x359   : > { %v1604_v45 = vor.u32 1.1754944e-38, %v1603_v26  ;;  %vm1602_vm5 = vcmp.eq.f32.partialorder %v1601_v31, 8.507059e+37 }
 0x35c   : > { %v3248_v20 = vpop.eup %3247 }
 0x35d   : > { %v3250_v21 = vpop.eup %3249  ;;  %v1578_v22 = vmul.f32 %v3248_v20, %v1575_v13  ;;  %vm1583_vm12 = vweird.f32 %v3248_v20 }
 0x35e   : > { %v1593_v40 = vmul.f32 %v3250_v21, %v1576_v14  ;;  %vm1598_vm13 = vweird.f32 %v3250_v21  ;;  %vm1584_vm15 = vmor %vm1582_vm14, %vm1583_vm12  ;;  %v3252_v43 = vpop.eup %3251 }
 0x35f   : > { %v1579_v25 = vsub.f32 1.0, %v1578_v22  ;;  %vm1599_vm4 = vmor %vm1597_vm2, %vm1598_vm13  ;;  %v1627_v22 = vrot.slane %v4272_v52, 6 }
 0x360   : > { %v1594_v46 = vsub.f32 1.0, %v1593_v40  ;;  %v1628_v40 = vrot.slane %v4315_v12, 6 }
 0x361   : > { %v1580_v16 = vmul.f32 %v3248_v20, %v1579_v25  ;;  %v1631_v28 = vsel %vm4266_vm0, %v4259_v41, %v1627_v22 }
 0x362   : > { %v1595_v30 = vmul.f32 %v3250_v21, %v1594_v46  ;;  %v1632_v26 = vsel %vm4306_vm1, %v4302_v47, %v1628_v40 }
 0x363   : > { %v1581_v32 = vadd.f32 %v3248_v20, %v1580_v16 }
 0x364   : > { %v1596_v34 = vadd.f32 %v3250_v21, %v1595_v30 }
 0x365   : > { %v1585_v44 = vsel %vm1584_vm15, %v3248_v20, %v1581_v32 }
 0x366   : > { %v1590_v53 = vsel %vm1587_vm3, %v1589_v33, %v1585_v44  ;;  %v1600_v36 = vsel %vm1599_vm4, %v3250_v21, %v1596_v34 }
 0x367   : > { %v1605_v54 = vsel %vm1602_vm5, %v1604_v45, %v1600_v36  ;;  %v1612_v8 = vmul.f32 %v1610_v37, %v1590_v53 }
 0x368   : > { %v1608_v9 = vsel %vm1374_vm7, %v3252_v43, %v1605_v54 }
 0x369   : > { %v1613_v51 = vmul.f32 %v1608_v9, %v1590_v53 }
 0x36b   : > { %1615 = vrot.lane.b32.xlu1 %v1613_v51, %s3590_s29 }
 0x3dd   : > { %v1616_v10 = vpop.permute.xlu1 %1615 }
 0x3de   : > { %v4378_v13 = vadd.f32 %v1616_v10, %v1612_v8 }
 0x3e0   : > { %3253 = vtanh.f32 %v4378_v13 }
 0x3e6   : > { %v3254_v29 = vpop.eup %3253 }
 0x3e7   : > { %v1620_v14 = vmul.f32 %v3254_v29, %v1608_v9 }
 0x3e9   : > { %v1634_v20 = vrot.slane %v1620_v14, 2 }
 0x3eb   : > { %1635 = vrot.lane.b32.xlu1 %v1634_v20, %s3590_s29 }
 0x45d   : > { %v1636_v21 = vpop.permute.xlu1 %1635 }
 0x45e   : > { %3019 = vmatmul.msk.f32.vlgmr.msra.gmra.mxu0 %vm1405_vm11, %v1636_v21  ;;  %3020 = vmatmul.msk.f32.vlgmr.msrb.gmra.mxu1 %vm1405_vm11, %v1636_v21  ;;  %v1730_v21 = vrot.slane %v4378_v13, 6 }
 0x45f   : > { %2108 = vmatpush.msra.mxu0 %v4125_v59  ;;  %2128 = vmatpush.msrb.mxu1 %v4128_v60 }
 0x461   : > { %2109 = vmatpush.msra.mxu0 %v4132_v58  ;;  %2129 = vmatpush.msrb.mxu1 %v4137_v61 }
 0x463   : > { %2110 = vmatpush.msra.mxu0 %v4142_v62  ;;  %2130 = vmatpush.msrb.mxu1 %v4147_v63 }
 0x465   : > { %2111 = vmatpush.msra.mxu0 %v4150_v0  ;;  %2131 = vmatpush.msrb.mxu1 %v4156_v11 }
 0x467   : > { %2112 = vmatpush.msra.mxu0 %v4160_v23  ;;  %2132 = vmatpush.msrb.mxu1 %v4166_v35 }
 0x469   : > { %2113 = vmatpush.msra.mxu0 %v4170_v39  ;;  %2133 = vmatpush.msrb.mxu1 %v4176_v5 }
 0x46b   : > { %2114 = vmatpush.msra.mxu0 %v4180_v1  ;;  %2134 = vmatpush.msrb.mxu1 %v4186_v2 }
 0x46d   : > { %2115 = vmatpush.msra.mxu0 %v4190_v3  ;;  %2135 = vmatpush.msrb.mxu1 %v4196_v4 }
 0x4db   : > { %v1656_v25 = vpop.f32.mrf.mxu0  ;;  %v1676_v27 = vpop.f32.mrf.mxu1 }
 0x4dc   : > { %v1681_v46 = vrot.slane %v1656_v25, 4  ;;  %v1682_v16 = vrot.slane %v1676_v27, 4 }
 0x4de   : > { %v1685_v30 = vadd.f32 %v1681_v46, %v1631_v28  ;;  %v1686_v31 = vadd.f32 %v1682_v16, %v1632_v26 }
 0x4e0   : > { %v3021_v32 = vmul.f32 -1.442695, %v1685_v30  ;;  %v3022_v33 = vmul.f32 -1.442695, %v1686_v31 }
 0x4e2   : > { %3255 = vpow2.f32 %v3021_v32 }
 0x4e3   : > { %3257 = vpow2.f32 %v3022_v33 }
 0x4e8   : > { %v3256_v52 = vpop.eup %3255 }
 0x4e9   : > { %v3258_v12 = vpop.eup %3257  ;;  %v1695_v34 = vadd.f32 1.0, %v3256_v52 }
 0x4ea   : > { %v1696_v37 = vadd.f32 1.0, %v3258_v12 }
 0x4eb   : > { %3259 = vrcp.f32 %v1695_v34  ;;  %v1708_v36 = vand.u32 2147483648, %v1695_v34  ;;  %v1706_v8 = vand.u32 2147483647, %v1695_v34  ;;  %vm1702_vm9 = vweird.f32 %v1695_v34 }
 0x4ec   : > { %3261 = vrcp.f32 %v1696_v37  ;;  %v1723_v9 = vand.u32 2147483648, %v1696_v37  ;;  %v1721_v10 = vand.u32 2147483647, %v1696_v37  ;;  %vm1717_vm12 = vweird.f32 %v1696_v37 }
 0x4ed   : > { %3263 = vtanh.f32 %v1686_v31  ;;  %v1709_v14 = vor.u32 1.1754944e-38, %v1708_v36  ;;  %vm1707_vm13 = vcmp.eq.f32.partialorder %v1706_v8, 8.507059e+37 }
 0x4ee   : > { %v1724_v40 = vor.u32 1.1754944e-38, %v1723_v9  ;;  %vm1722_vm15 = vcmp.eq.f32.partialorder %v1721_v10, 8.507059e+37 }
 0x4f1   : > { %v3260_v44 = vpop.eup %3259 }
 0x4f2   : > { %v3262_v45 = vpop.eup %3261  ;;  %v1698_v43 = vmul.f32 %v3260_v44, %v1695_v34  ;;  %vm1703_vm6 = vweird.f32 %v3260_v44 }
 0x4f3   : > { %v1713_v41 = vmul.f32 %v3262_v45, %v1696_v37  ;;  %vm1718_vm8 = vweird.f32 %v3262_v45  ;;  %vm1704_vm10 = vmor %vm1702_vm9, %vm1703_vm6  ;;  %v3264_v25 = vpop.eup %3263 }
 0x4f4   : > { %v1699_v53 = vsub.f32 1.0, %v1698_v43  ;;  %vm1719_vm14 = vmor %vm1717_vm12, %vm1718_vm8 }
 0x4f5   : > { %v1714_v47 = vsub.f32 1.0, %v1713_v41 }
 0x4f6   : > { %v1700_v54 = vmul.f32 %v3260_v44, %v1699_v53 }
 0x4f7   : > { %v1715_v51 = vmul.f32 %v3262_v45, %v1714_v47 }
 0x4f8   : > { %v1701_v29 = vadd.f32 %v3260_v44, %v1700_v54 }
 0x4f9   : > { %v1716_v20 = vadd.f32 %v3262_v45, %v1715_v51 }
 0x4fa   : > { %v1705_v22 = vsel %vm1704_vm10, %v3260_v44, %v1701_v29 }
 0x4fb   : > { %v1710_v27 = vsel %vm1707_vm13, %v1709_v14, %v1705_v22  ;;  %v1720_v46 = vsel %vm1719_vm14, %v3262_v45, %v1716_v20 }
 0x4fc   : > { %v1725_v16 = vsel %vm1722_vm15, %v1724_v40, %v1720_v46  ;;  %v1732_v28 = vmul.f32 %v1730_v21, %v1710_v27 }
 0x4fd   : > { %v1728_v26 = vsel %vm1374_vm7, %v3264_v25, %v1725_v16 }
 0x4fe   : > { %v1733_v30 = vmul.f32 %v1728_v26, %v1710_v27 }
 0x500   : > { %1735 = vrot.lane.b32.xlu2 %v1733_v30, %s3590_s29 }
 0x55a   : > { %v1736_v31 = vpop.permute.xlu2 %1735 }
 0x55b   : > { %v4412_v32 = vadd.f32 %v1736_v31, %v1732_v28 }
 0x55d   : > { %3265 = vtanh.f32 %v4412_v32  ;;  %v1850_v54 = vrot.slane %v4412_v32, 6 }
 0x563   : > { %v3266_v13 = vpop.eup %3265 }
 0x564   : > { %v1740_v33 = vmul.f32 %v3266_v13, %v1728_v26 }
 0x566   : > { %v1754_v52 = vrot.slane %v1740_v33, 4 }
 0x568   : > { %1755 = vrot.lane.b32.xlu2 %v1754_v52, %s3590_s29 }
 0x5c2   : > { %v1756_v12 = vpop.permute.xlu2 %1755 }
 0x5c3   : > { %3023 = vmatmul.msk.f32.vlgmr.msrb.gmra.mxu2 %vm1405_vm11, %v1756_v12  ;;  %3024 = vmatmul.msk.f32.vlgmr.msra.gmra.mxu3 %vm1405_vm11, %v1756_v12 }
 0x5c4   : > { %2224 = vmatpush.msrb.mxu2 %v4125_v59  ;;  %2244 = vmatpush.msra.mxu3 %v4128_v60  ;;  %v1747_v59 = vrot.slane %v4274_v55, 2  ;;  %v1748_v60 = vrot.slane %v4317_v15, 2 }
 0x5c6   : > { %2225 = vmatpush.msrb.mxu2 %v4132_v58  ;;  %2245 = vmatpush.msra.mxu3 %v4137_v61 }
 0x5c8   : > { %2226 = vmatpush.msrb.mxu2 %v4142_v62  ;;  %2246 = vmatpush.msra.mxu3 %v4147_v63 }
 0x5ca   : > { %2227 = vmatpush.msrb.mxu2 %v4150_v0  ;;  %2247 = vmatpush.msra.mxu3 %v4156_v11  ;;  %v1751_v0 = vsel %vm4266_vm0, %v4261_v42, %v1747_v59  ;;  %v1752_v11 = vsel %vm4306_vm1, %v4304_v48, %v1748_v60 }
 0x5cc   : > { %2228 = vmatpush.msrb.mxu2 %v4160_v23  ;;  %2248 = vmatpush.msra.mxu3 %v4166_v35 }
 0x5ce   : > { %2229 = vmatpush.msrb.mxu2 %v4170_v39  ;;  %2249 = vmatpush.msra.mxu3 %v4176_v5 }
 0x5d0   : > { %2230 = vmatpush.msrb.mxu2 %v4180_v1  ;;  %2250 = vmatpush.msra.mxu3 %v4186_v2 }
 0x5d2   : > { %2231 = vmatpush.msrb.mxu2 %v4190_v3  ;;  %2251 = vmatpush.msra.mxu3 %v4196_v4 }
 0x646   : > { %v1776_v58 = vpop.f32.mrf.mxu2  ;;  %v1796_v61 = vpop.f32.mrf.mxu3 }
 0x647   : > { %v1801_v62 = vrot.slane %v1776_v58, 2  ;;  %v1802_v63 = vrot.slane %v1796_v61, 2 }
 0x649   : > { %v1805_v23 = vadd.f32 %v1801_v62, %v1751_v0  ;;  %v1806_v35 = vadd.f32 %v1802_v63, %v1752_v11 }
 0x64b   : > { %v3025_v39 = vmul.f32 -1.442695, %v1805_v23  ;;  %v3026_v5 = vmul.f32 -1.442695, %v1806_v35 }
 0x64d   : > { %3267 = vpow2.f32 %v3025_v39 }
 0x64e   : > { %3269 = vpow2.f32 %v3026_v5 }
 0x653   : > { %v3268_v1 = vpop.eup %3267 }
 0x654   : > { %v3270_v2 = vpop.eup %3269  ;;  %v1815_v3 = vadd.f32 1.0, %v3268_v1 }
 0x655   : > { %v1816_v4 = vadd.f32 1.0, %v3270_v2 }
 0x656   : > { %3271 = vrcp.f32 %v1815_v3  ;;  %v1828_v50 = vand.u32 2147483648, %v1815_v3  ;;  %v1826_v44 = vand.u32 2147483647, %v1815_v3  ;;  %vm1822_vm2 = vweird.f32 %v1815_v3 }
 0x657   : > { %3273 = vrcp.f32 %v1816_v4  ;;  %v1843_v45 = vand.u32 2147483648, %v1816_v4  ;;  %v1841_v41 = vand.u32 2147483647, %v1816_v4  ;;  %vm1837_vm4 = vweird.f32 %v1816_v4 }
 0x658   : > { %3275 = vtanh.f32 %v1806_v35  ;;  %v1829_v36 = vor.u32 1.1754944e-38, %v1828_v50  ;;  %vm1827_vm5 = vcmp.eq.f32.partialorder %v1826_v44, 8.507059e+37 }
 0x659   : > { %v1844_v9 = vor.u32 1.1754944e-38, %v1843_v45  ;;  %vm1842_vm8 = vcmp.eq.f32.partialorder %v1841_v41, 8.507059e+37 }
 0x65c   : > { %v3272_v55 = vpop.eup %3271 }
 0x65d   : > { %v3274_v15 = vpop.eup %3273  ;;  %v1818_v49 = vmul.f32 %v3272_v55, %v1815_v3  ;;  %vm1823_vm0 = vweird.f32 %v3272_v55 }
 0x65e   : > { %v1833_v42 = vmul.f32 %v3274_v15, %v1816_v4  ;;  %vm1838_vm1 = vweird.f32 %v3274_v15  ;;  %vm1824_vm3 = vmor %vm1822_vm2, %vm1823_vm0  ;;  %v3276_v51 = vpop.eup %3275 }
 0x65f   : > { %v1819_v34 = vsub.f32 1.0, %v1818_v49  ;;  %vm1839_vm6 = vmor %vm1837_vm4, %vm1838_vm1 }
 0x660   : > { %v1834_v48 = vsub.f32 1.0, %v1833_v42 }
 0x661   : > { %v1820_v37 = vmul.f32 %v3272_v55, %v1819_v34 }
 0x662   : > { %v1835_v43 = vmul.f32 %v3274_v15, %v1834_v48 }
 0x663   : > { %v1821_v53 = vadd.f32 %v3272_v55, %v1820_v37 }
 0x664   : > { %v1836_v47 = vadd.f32 %v3274_v15, %v1835_v43 }
 0x665   : > { %v1825_v8 = vsel %vm1824_vm3, %v3272_v55, %v1821_v53 }
 0x666   : > { %v1830_v10 = vsel %vm1827_vm5, %v1829_v36, %v1825_v8  ;;  %v1840_v29 = vsel %vm1839_vm6, %v3274_v15, %v1836_v47 }
 0x667   : > { %v1845_v14 = vsel %vm1842_vm8, %v1844_v9, %v1840_v29  ;;  %v1852_v20 = vmul.f32 %v1850_v54, %v1830_v10 }
 0x668   : > { %v1848_v21 = vsel %vm1374_vm7, %v3276_v51, %v1845_v14 }
 0x669   : > { %v1853_v22 = vmul.f32 %v1848_v21, %v1830_v10 }
 0x66b   : > { %1855 = vrot.lane.b32.xlu0 %v1853_v22, %s3590_s29 }
 0x6dd   : > { %v1856_v40 = vpop.permute.xlu0 %1855 }
 0x6de   : > { %v1858_v25 = vadd.f32 %v1856_v40, %v1852_v20 }
 0x6e0   : > { %3277 = vtanh.f32 %v1858_v25  ;;  %v1960_v4 = vrot.slane %v1858_v25, 6 }
 0x6e6   : > { %v3278_v27 = vpop.eup %3277 }
 0x6e7   : > { %v1860_v46 = vmul.f32 %v3278_v27, %v1848_v21 }
 0x6e9   : > { %v1870_v16 = vrot.slane %v1860_v46, 6 }
 0x6eb   : > { %1871 = vrot.lane.b32.xlu1 %v1870_v16, %s3590_s29 }
 0x75d   : > { %v1872_v28 = vpop.permute.xlu1 %1871 }
 0x75e   : > { %3027 = vmatmul.msk.f32.vlgmr.msrb.gmra.mxu0 %vm1405_vm11, %v1872_v28  ;;  %3028 = vmatmul.msk.f32.vlgmr.msra.gmra.mxu1 %vm1405_vm11, %v1872_v28 }
 0x7db   : > { %v1892_v26 = vpop.f32.mrf.mxu0  ;;  %v1912_v30 = vpop.f32.mrf.mxu1 }
 0x7dc   : > { %v1915_v31 = vadd.f32 %v1892_v26, %v4279_v56  ;;  %v1916_v32 = vadd.f32 %v1912_v30, %v4322_v17 }
 0x7de   : > { %v3029_v13 = vmul.f32 -1.442695, %v1915_v31  ;;  %v3030_v33 = vmul.f32 -1.442695, %v1916_v32 }
 0x7e0   : > { %3279 = vpow2.f32 %v3029_v13 }
 0x7e1   : > { %3281 = vpow2.f32 %v3030_v33 }
 0x7e6   : > { %v3280_v52 = vpop.eup %3279 }
 0x7e7   : > { %v3282_v12 = vpop.eup %3281  ;;  %v1925_v59 = vadd.f32 1.0, %v3280_v52 }
 0x7e8   : > { %v1926_v60 = vadd.f32 1.0, %v3282_v12 }
 0x7e9   : > { %3283 = vrcp.f32 %v1925_v59  ;;  %v1938_v56 = vand.u32 2147483648, %v1925_v59  ;;  %v1936_v17 = vand.u32 2147483647, %v1925_v59  ;;  %vm1932_vm12 = vweird.f32 %v1925_v59 }
 0x7ea   : > { %3285 = vrcp.f32 %v1926_v60  ;;  %v1953_v35 = vand.u32 2147483648, %v1926_v60  ;;  %v1951_v5 = vand.u32 2147483647, %v1926_v60  ;;  %vm1947_vm14 = vweird.f32 %v1926_v60 }
 0x7eb   : > { %3287 = vtanh.f32 %v1916_v32  ;;  %v1939_v2 = vor.u32 1.1754944e-38, %v1938_v56  ;;  %vm1937_vm15 = vcmp.eq.f32.partialorder %v1936_v17, 8.507059e+37 }
 0x7ec   : > { %v1954_v15 = vor.u32 1.1754944e-38, %v1953_v35  ;;  %vm1952_vm1 = vcmp.eq.f32.partialorder %v1951_v5, 8.507059e+37 }
 0x7ef   : > { %v3284_v58 = vpop.eup %3283 }
 0x7f0   : > { %v3286_v61 = vpop.eup %3285  ;;  %v1928_v62 = vmul.f32 %v3284_v58, %v1925_v59  ;;  %vm1933_vm9 = vweird.f32 %v3284_v58 }
 0x7f1   : > { %v1943_v63 = vmul.f32 %v3286_v61, %v1926_v60  ;;  %vm1948_vm10 = vweird.f32 %v3286_v61  ;;  %vm1934_vm13 = vmor %vm1932_vm12, %vm1933_vm9  ;;  %v3288_v49 = vpop.eup %3287 }
 0x7f2   : > { %v1929_v0 = vsub.f32 1.0, %v1928_v62  ;;  %vm1949_vm0 = vmor %vm1947_vm14, %vm1948_vm10 }
 0x7f3   : > { %v1944_v11 = vsub.f32 1.0, %v1943_v63 }
 0x7f4   : > { %v1930_v23 = vmul.f32 %v3284_v58, %v1929_v0 }
 0x7f5   : > { %v1945_v39 = vmul.f32 %v3286_v61, %v1944_v11 }
 0x7f6   : > { %v1931_v1 = vadd.f32 %v3284_v58, %v1930_v23 }
 0x7f7   : > { %v1946_v3 = vadd.f32 %v3286_v61, %v1945_v39 }
 0x7f8   : > { %v1935_v55 = vsel %vm1934_vm13, %v3284_v58, %v1931_v1 }
 0x7f9   : > { %v1940_v42 = vsel %vm1937_vm15, %v1939_v2, %v1935_v55  ;;  %v1950_v34 = vsel %vm1949_vm0, %v3286_v61, %v1946_v3 }
 0x7fa   : > { %v1955_v50 = vsel %vm1952_vm1, %v1954_v15, %v1950_v34  ;;  %v1962_v48 = vmul.f32 %v1960_v4, %v1940_v42 }
 0x7fb   : > { %v1958_v37 = vsel %vm1374_vm7, %v3288_v49, %v1955_v50 }
 0x7fc   : > { %v1963_v44 = vmul.f32 %v1958_v37, %v1940_v42 }
 0x7fe   : > { %1965 = vrot.lane.b32.xlu2 %v1963_v44, %s3590_s29 }
 0x858   : > { %v1966_v45 = vpop.permute.xlu2 %1965 }
 0x859   : > { %v1968_v43 = vadd.f32 %v1966_v45, %v1962_v48 }
 0x85b   : > { %3289 = vtanh.f32 %v1968_v43  ;;  %v2075_v59 = vrot.slane %v1968_v43, 6 }
 0x861   : > { %v3290_v41 = vpop.eup %3289 }
 0x862   : > { %v1970_v53 = vmul.f32 %v3290_v41, %v1958_v37 }
 0x864   : > { %1980 = vrot.lane.b32.xlu0 %v1970_v53, %s3590_s29 }
 0x8d6   : > { %v1981_v36 = vpop.permute.xlu0 %1980 }
 0x8d7   : > { %3031 = vmatmul.msk.f32.vlgmr.msra.gmra.mxu2 %vm1405_vm11, %v1981_v36  ;;  %3032 = vmatmul.msk.f32.vlgmr.msrb.gmra.mxu3 %vm1405_vm11, %v1981_v36 }
 0x95a   : > { %v2001_v47 = vpop.f32.mrf.mxu2  ;;  %v2021_v54 = vpop.f32.mrf.mxu3 }
 0x95b   : > { %v2026_v8 = vrot.slane %v2001_v47, 6  ;;  %v2027_v9 = vrot.slane %v2021_v54, 6 }
 0x95d   : > { %v2030_v51 = vadd.f32 %v2026_v8, %v4284_v57  ;;  %v2031_v10 = vadd.f32 %v2027_v9, %v4327_v18 }
 0x95f   : > { %v3033_v29 = vmul.f32 -1.442695, %v2030_v51  ;;  %v3034_v14 = vmul.f32 -1.442695, %v2031_v10 }
 0x961   : > { %3291 = vpow2.f32 %v3033_v29 }
 0x962   : > { %3293 = vpow2.f32 %v3034_v14 }
 0x967   : > { %v3292_v20 = vpop.eup %3291 }
 0x968   : > { %v3294_v21 = vpop.eup %3293  ;;  %v2040_v22 = vadd.f32 1.0, %v3292_v20 }
 0x969   : > { %v2041_v40 = vadd.f32 1.0, %v3294_v21 }
 0x96a   : > { %3295 = vrcp.f32 %v2040_v22  ;;  %v2053_v26 = vand.u32 2147483648, %v2040_v22  ;;  %v2051_v18 = vand.u32 2147483647, %v2040_v22  ;;  %vm2047_vm4 = vweird.f32 %v2040_v22 }
 0x96b   : > { %3297 = vrcp.f32 %v2041_v40  ;;  %v2068_v31 = vand.u32 2147483648, %v2041_v40  ;;  %v2066_v13 = vand.u32 2147483647, %v2041_v40  ;;  %vm2062_vm6 = vweird.f32 %v2041_v40 }
 0x96c   : > { %3299 = vtanh.f32 %v2031_v10  ;;  %v2054_v52 = vor.u32 1.1754944e-38, %v2053_v26  ;;  %vm2052_vm8 = vcmp.eq.f32.partialorder %v2051_v18, 8.507059e+37 }
 0x96d   : > { %v2069_v58 = vor.u32 1.1754944e-38, %v2068_v31  ;;  %vm2067_vm10 = vcmp.eq.f32.partialorder %v2066_v13, 8.507059e+37 }
 0x970   : > { %v3296_v25 = vpop.eup %3295 }
 0x971   : > { %v3298_v27 = vpop.eup %3297  ;;  %v2043_v46 = vmul.f32 %v3296_v25, %v2040_v22  ;;  %vm2048_vm2 = vweird.f32 %v3296_v25 }
 0x972   : > { %v2058_v16 = vmul.f32 %v3298_v27, %v2041_v40  ;;  %vm2063_vm3 = vweird.f32 %v3298_v27  ;;  %vm2049_vm5 = vmor %vm2047_vm4, %vm2048_vm2  ;;  %v3300_v61 = vpop.eup %3299 }
 0x973   : > { %v2044_v28 = vsub.f32 1.0, %v2043_v46  ;;  %vm2064_vm9 = vmor %vm2062_vm6, %vm2063_vm3 }
 0x974   : > { %v2059_v57 = vsub.f32 1.0, %v2058_v16 }
 0x975   : > { %v2045_v30 = vmul.f32 %v3296_v25, %v2044_v28 }
 0x976   : > { %v2060_v32 = vmul.f32 %v3298_v27, %v2059_v57 }
 0x977   : > { %v2046_v33 = vadd.f32 %v3296_v25, %v2045_v30 }
 0x978   : > { %v2061_v12 = vadd.f32 %v3298_v27, %v2060_v32 }
 0x979   : > { %v2050_v60 = vsel %vm2049_vm5, %v3296_v25, %v2046_v33 }
 0x97a   : > { %v2055_v62 = vsel %vm2052_vm8, %v2054_v52, %v2050_v60  ;;  %v2065_v63 = vsel %vm2064_vm9, %v3298_v27, %v2061_v12 }
 0x97b   : > { %v2070_v0 = vsel %vm2067_vm10, %v2069_v58, %v2065_v63  ;;  %v2077_v11 = vmul.f32 %v2075_v59, %v2055_v62 }
 0x97c   : > { %v2073_v56 = vsel %vm1374_vm7, %v3300_v61, %v2070_v0 }
 0x97d   : > { %v2078_v23 = vmul.f32 %v2073_v56, %v2055_v62 }
 0x97f   : > { %2080 = vrot.lane.b32.xlu1 %v2078_v23, %s3590_s29 }
 0x9f1   : > { %v2081_v17 = vpop.permute.xlu1 %2080 }
 0x9f2   : > { %v2083_v35 = vadd.f32 %v2081_v17, %v2077_v11 }
 0x9f4   : > { %3301 = vtanh.f32 %v2083_v35  ;;  %v2191_v21 = vrot.slane %v2083_v35, 6 }
 0x9fa   : > { %v3302_v39 = vpop.eup %3301 }
 0x9fb   : > { %v2085_v5 = vmul.f32 %v3302_v39, %v2073_v56 }
 0x9fd   : > { %v2095_v1 = vrot.slane %v2085_v5, 2 }
 0x9ff   : > { %2096 = vrot.lane.b32.xlu2 %v2095_v1, %s3590_s29 }
 0xa59   : > { %v2097_v2 = vpop.permute.xlu2 %2096 }
 0xa5a   : > { %3035 = vmatmul.msk.f32.vlgmr.msra.gmra.mxu0 %vm1405_vm11, %v2097_v2  ;;  %3036 = vmatmul.msk.f32.vlgmr.msrb.gmra.mxu1 %vm1405_vm11, %v2097_v2 }
 0xad7   : > { %v2117_v3 = vpop.f32.mrf.mxu0  ;;  %v2137_v4 = vpop.f32.mrf.mxu1 }
 0xad8   : > { %v2142_v55 = vrot.slane %v2117_v3, 4  ;;  %v2143_v15 = vrot.slane %v2137_v4, 4 }
 0xada   : > { %v2146_v49 = vadd.f32 %v2142_v55, %v4289_v6  ;;  %v2147_v42 = vadd.f32 %v2143_v15, %v4332_v19 }
 0xadc   : > { %v3037_v34 = vmul.f32 -1.442695, %v2146_v49  ;;  %v3038_v50 = vmul.f32 -1.442695, %v2147_v42 }
 0xade   : > { %3303 = vpow2.f32 %v3037_v34 }
 0xadf   : > { %3305 = vpow2.f32 %v3038_v50 }
 0xae4   : > { %v3304_v48 = vpop.eup %3303 }
 0xae5   : > { %v3306_v37 = vpop.eup %3305  ;;  %v2156_v44 = vadd.f32 1.0, %v3304_v48 }
 0xae6   : > { %v2157_v45 = vadd.f32 1.0, %v3306_v37 }
 0xae7   : > { %3307 = vrcp.f32 %v2156_v44  ;;  %v2169_v54 = vand.u32 2147483648, %v2156_v44  ;;  %v2167_v19 = vand.u32 2147483647, %v2156_v44  ;;  %vm2163_vm14 = vweird.f32 %v2156_v44 }
 0xae8   : > { %3309 = vrcp.f32 %v2157_v45  ;;  %v2184_v9 = vand.u32 2147483648, %v2157_v45  ;;  %v2182_v10 = vand.u32 2147483647, %v2157_v45  ;;  %vm2178_vm0 = vweird.f32 %v2157_v45 }
 0xae9   : > { %3311 = vtanh.f32 %v2147_v42  ;;  %v2170_v14 = vor.u32 1.1754944e-38, %v2169_v54  ;;  %vm2168_vm1 = vcmp.eq.f32.partialorder %v2167_v19, 8.507059e+37  ;;  %v2325_v54 = vld [vmem:[%s3863_s11 + $0x38] sm:$0xff]  ;;  %v2322_v19 = vld [vmem:[%s3863_s11 + $0x20] sm:$0xff] }
 0xaea   : > { %v2185_v40 = vor.u32 1.1754944e-38, %v2184_v9  ;;  %vm2183_vm3 = vcmp.eq.f32.partialorder %v2182_v10, 8.507059e+37  ;;  %2344 = vmatpush.msrb.mxu0 %v2325_v54  ;;  %v2321_v9 = vld [vmem:[%s3863_s11 + $0x18] sm:$0xff]  ;;  %v2318_v10 = vld [vmem:[%s3863_s11] sm:$0xff] }
 0xaed   : > { %v3308_v43 = vpop.eup %3307 }
 0xaee   : > { %v3310_v41 = vpop.eup %3309  ;;  %v2159_v53 = vmul.f32 %v3308_v43, %v2156_v44  ;;  %vm2164_vm12 = vweird.f32 %v3308_v43 }
 0xaef   : > { %v2174_v36 = vmul.f32 %v3310_v41, %v2157_v45  ;;  %vm2179_vm13 = vweird.f32 %v3310_v41  ;;  %vm2165_vm15 = vmor %vm2163_vm14, %vm2164_vm12  ;;  %v3312_v25 = vpop.eup %3311 }
 0xaf0   : > { %v2160_v47 = vsub.f32 1.0, %v2159_v53  ;;  %vm2180_vm2 = vmor %vm2178_vm0, %vm2179_vm13 }
 0xaf1   : > { %v2175_v6 = vsub.f32 1.0, %v2174_v36 }
 0xaf2   : > { %v2161_v8 = vmul.f32 %v3308_v43, %v2160_v47 }
 0xaf3   : > { %v2176_v51 = vmul.f32 %v3310_v41, %v2175_v6  ;;  %v2324_v6 = vld [vmem:[%s3863_s11 + $0x30] sm:$0xff] }
 0xaf4   : > { %v2162_v29 = vadd.f32 %v3308_v43, %v2161_v8  ;;  %v2323_v8 = vld [vmem:[%s3863_s11 + $0x28] sm:$0xff]  ;;  %2345 = vmatpush.msrb.mxu0 %v2324_v6 }
 0xaf5   : > { %v2177_v20 = vadd.f32 %v3310_v41, %v2176_v51  ;;  %v2320_v51 = vld [vmem:[%s3863_s11 + $0x10] sm:$0xff] }
 0xaf6   : > { %v2166_v22 = vsel %vm2165_vm15, %v3308_v43, %v2162_v29  ;;  %2346 = vmatpush.msrb.mxu0 %v2323_v8 }
 0xaf7   : > { %v2171_v27 = vsel %vm2168_vm1, %v2170_v14, %v2166_v22  ;;  %v2181_v46 = vsel %vm2180_vm2, %v3310_v41, %v2177_v20 }
 0xaf8   : > { %v2186_v16 = vsel %vm2183_vm3, %v2185_v40, %v2181_v46  ;;  %v2193_v28 = vmul.f32 %v2191_v21, %v2171_v27  ;;  %2347 = vmatpush.msrb.mxu0 %v2322_v19  ;;  %v2372_v40 = vld [vmem:[%s3870_s6 + $0x78] sm:$0xff]  ;;  %v2369_v46 = vld [vmem:[%s3870_s6 + $0x60] sm:$0xff] }
 0xaf9   : > { %v2189_v26 = vsel %vm1374_vm7, %v3312_v25, %v2186_v16  ;;  %v2371_v25 = vld [vmem:[%s3870_s6 + $0x70] sm:$0xff]  ;;  %2377 = vmatpush.msra.mxu1 %v2372_v40  ;;  %v2368_v16 = vld [vmem:[%s3870_s6 + $0x58] sm:$0xff] }
 0xafa   : > { %v2194_v57 = vmul.f32 %v2189_v26, %v2171_v27  ;;  %2348 = vmatpush.msrb.mxu0 %v2321_v9  ;;  %v2370_v27 = vld [vmem:[%s3870_s6 + $0x68] sm:$0xff] }
 0xafb   : > { %2378 = vmatpush.msra.mxu1 %v2371_v25 }
 0xafc   : > { %2196 = vrot.lane.b32.xlu0 %v2194_v57, %s3590_s29  ;;  %2349 = vmatpush.msrb.mxu0 %v2320_v51  ;;  %v2365_v57 = vld [vmem:[%s3870_s6 + $0x40] sm:$0xff] }
 0xafd   : > { %2379 = vmatpush.msra.mxu1 %v2370_v27 }
 0xafe   : > { %2350 = vmatpush.msrb.mxu0 %v2319_v38 }
 0xaff   : > { %2380 = vmatpush.msra.mxu1 %v2369_v46 }
 0xb00   : > { %2351 = vmatpush.msrb.mxu0 %v2318_v10 }
 0xb01   : > { %2381 = vmatpush.msra.mxu1 %v2368_v16 }
 0xb6e   : > { %v2197_v30 = vpop.permute.xlu0 %2196 }
 0xb6f   : > { %v2199_v18 = vadd.f32 %v2197_v30, %v2193_v28  ;;  %v2367_v28 = vld [vmem:[%s3870_s6 + $0x50] sm:$0xff]  ;;  %v2364_v30 = vld [vmem:[%s3870_s6 + $0x38] sm:$0xff] }
 0xb70   : > { %2382 = vmatpush.msra.mxu1 %v2367_v28 }
 0xb71   : > { %3313 = vtanh.f32 %v2199_v18  ;;  %v2307_v50 = vrot.slane %v2199_v18, 6  ;;  %v2363_v18 = vld [vmem:[%s3870_s6 + $0x30] sm:$0xff] }
 0xb77   : > { %v3314_v31 = vpop.eup %3313 }
 0xb78   : > { %v2201_v32 = vmul.f32 %v3314_v31, %v2189_v26  ;;  %v2366_v26 = vld [vmem:[%s3870_s6 + $0x48] sm:$0xff] }
 0xb79   : > { %2383 = vmatpush.msra.mxu1 %v2366_v26  ;;  %v2362_v31 = vld [vmem:[%s3870_s6 + $0x28] sm:$0xff] }
 0xb7a   : > { %v2211_v13 = vrot.slane %v2201_v32, 4  ;;  %v2361_v32 = vld [vmem:[%s3870_s6 + $0x20] sm:$0xff] }
 0xb7b   : > { %2384 = vmatpush.msra.mxu1 %v2365_v57 }
 0xb7c   : > { %2212 = vrot.lane.b32.xlu1 %v2211_v13, %s3590_s29  ;;  %v2360_v13 = vld [vmem:[%s3870_s6 + $0x18] sm:$0xff] }
 0xb7d   : > { %2385 = vmatpush.msra.mxu1 %v2364_v30 }
 0xb7f   : > { %2386 = vmatpush.msra.mxu1 %v2363_v18 }
 0xb81   : > { %2387 = vmatpush.msra.mxu1 %v2362_v31 }
 0xb83   : > { %2388 = vmatpush.msra.mxu1 %v2361_v32 }
 0xb85   : > { %2389 = vmatpush.msra.mxu1 %v2360_v13 }
 0xbee   : > { %v2213_v33 = vpop.permute.xlu1 %2212 }
 0xbef   : > { %3039 = vmatmul.msk.f32.vlgmr.msrb.gmra.mxu2 %vm1405_vm11, %v2213_v33  ;;  %3040 = vmatmul.msk.f32.vlgmr.msra.gmra.mxu3 %vm1405_vm11, %v2213_v33 }
 0xc72   : > { %v2233_v52 = vpop.f32.mrf.mxu2  ;;  %v2253_v12 = vpop.f32.mrf.mxu3 }
 0xc73   : > { %v2258_v59 = vrot.slane %v2233_v52, 2  ;;  %v2259_v60 = vrot.slane %v2253_v12, 2  ;;  %v2359_v52 = vld [vmem:[%s3870_s6 + $0x10] sm:$0xff]  ;;  %v2358_v12 = vld [vmem:[%s3870_s6 + $0x8] sm:$0xff] }
 0xc74   : > { %2390 = vmatpush.msra.mxu1 %v2359_v52 }
 0xc75   : > { %v2262_v58 = vadd.f32 %v2258_v59, %v4293_v7  ;;  %v2263_v61 = vadd.f32 %v2259_v60, %v4338_v24  ;;  %v2357_v59 = vld [vmem:[%s3870_s6] sm:$0xff]  ;;  %v3229_v60 = vld [vmem:[%s468_s8] ss:$0 sm:$0xff] }
 0xc76   : > { %2391 = vmatpush.msra.mxu1 %v2358_v12 }
 0xc77   : > { %v3041_v62 = vmul.f32 -1.442695, %v2262_v58  ;;  %v3042_v63 = vmul.f32 -1.442695, %v2263_v61 }
 0xc78   : > { %2392 = vmatpush.msra.mxu1 %v2357_v59 }
 0xc79   : > { %3315 = vpow2.f32 %v3041_v62 }
 0xc7a   : > { %3317 = vpow2.f32 %v3042_v63  ;;  %v3230_v63 = vld [vmem:[%s487_s22] ss:$0 sm:$0xff] }
 0xc7f   : > { %v3316_v0 = vpop.eup %3315 }
 0xc80   : > { %v3318_v11 = vpop.eup %3317  ;;  %v2272_v56 = vadd.f32 1.0, %v3316_v0 }
 0xc81   : > { %v2273_v23 = vadd.f32 1.0, %v3318_v11 }
 0xc82   : > { %3319 = vrcp.f32 %v2272_v56  ;;  %v2285_v2 = vand.u32 2147483648, %v2272_v56  ;;  %v2283_v24 = vand.u32 2147483647, %v2272_v56  ;;  %vm2279_vm6 = vweird.f32 %v2272_v56 }
 0xc83   : > { %3321 = vrcp.f32 %v2273_v23  ;;  %v2300_v4 = vand.u32 2147483648, %v2273_v23  ;;  %v2298_v15 = vand.u32 2147483647, %v2273_v23  ;;  %vm2294_vm9 = vweird.f32 %v2273_v23 }
 0xc84   : > { %3323 = vtanh.f32 %v2263_v61  ;;  %v2286_v42 = vor.u32 1.1754944e-38, %v2285_v2  ;;  %vm2284_vm10 = vcmp.eq.f32.partialorder %v2283_v24, 8.507059e+37 }
 0xc85   : > { %v2301_v37 = vor.u32 1.1754944e-38, %v2300_v4  ;;  %vm2299_vm13 = vcmp.eq.f32.partialorder %v2298_v15, 8.507059e+37 }
 0xc88   : > { %v3320_v17 = vpop.eup %3319 }
 0xc89   : > { %v3322_v35 = vpop.eup %3321  ;;  %v2275_v39 = vmul.f32 %v3320_v17, %v2272_v56  ;;  %vm2280_vm4 = vweird.f32 %v3320_v17 }
 0xc8a   : > { %v2290_v5 = vmul.f32 %v3322_v35, %v2273_v23  ;;  %vm2295_vm5 = vweird.f32 %v3322_v35  ;;  %vm2281_vm8 = vmor %vm2279_vm6, %vm2280_vm4  ;;  %v3324_v44 = vpop.eup %3323 }
 0xc8b   : > { %v2276_v1 = vsub.f32 1.0, %v2275_v39  ;;  %vm2296_vm12 = vmor %vm2294_vm9, %vm2295_vm5 }
 0xc8c   : > { %v2291_v7 = vsub.f32 1.0, %v2290_v5 }
 0xc8d   : > { %v2277_v3 = vmul.f32 %v3320_v17, %v2276_v1 }
 0xc8e   : > { %v2292_v55 = vmul.f32 %v3322_v35, %v2291_v7 }
 0xc8f   : > { %v2278_v49 = vadd.f32 %v3320_v17, %v2277_v3 }
 0xc90   : > { %v2293_v34 = vadd.f32 %v3322_v35, %v2292_v55 }
 0xc91   : > { %v2282_v48 = vsel %vm2281_vm8, %v3320_v17, %v2278_v49 }
 0xc92   : > { %v2287_v45 = vsel %vm2284_vm10, %v2286_v42, %v2282_v48  ;;  %v2297_v43 = vsel %vm2296_vm12, %v3322_v35, %v2293_v34 }
 0xc93   : > { %v2302_v41 = vsel %vm2299_vm13, %v2301_v37, %v2297_v43  ;;  %v2309_v53 = vmul.f32 %v2307_v50, %v2287_v45 }
 0xc94   : > { %v2305_v36 = vsel %vm1374_vm7, %v3324_v44, %v2302_v41 }
 0xc95   : > { %v2310_v47 = vmul.f32 %v2305_v36, %v2287_v45 }
 0xc97   : > { %2312 = vrot.lane.b32.xlu2 %v2310_v47, %s3590_s29 }
 0xcf1   : > { %v2313_v29 = vpop.permute.xlu2 %2312 }
 0xcf2   : > { %v2315_v14 = vadd.f32 %v2313_v29, %v2309_v53 }
 0xcf4   : > { %3325 = vtanh.f32 %v2315_v14 }
 0xcfa   : > { %v3326_v20 = vpop.eup %3325 }
 0xcfb   : > { %v2317_v21 = vmul.f32 %v3326_v20, %v2305_v36 }
 0xcfd   : > { %v2331_v22 = vrot.slane %v2317_v21, 6 }
 0xcff   : > { %2332 = vrot.lane.b32.xlu0 %v2331_v22, %s3590_s29 }
 0xd71   : > { %v2333_v33 = vpop.permute.xlu0 %2332 }
 0xd72   : > { %3043 = vmatmul.msk.f32.vlgmr.msrb.gmra.mxu0 %vm1405_vm11, %v2333_v33 }
 0xdef   : > { %v2353_v58 = vpop.f32.mrf.mxu0 }
 0xdf0   : > { %v2354_v61 = vadd.f32 %v3229_v60, %v2353_v58 }
 0xdf2   : > { %v2356_v62 = vmax.f32 %v2354_v61, 0.0 }
 0xdf4   : > { %2393 = vmatmul.f32.vlgmr.msra.gmra.mxu1 %v2356_v62 }
 0xe71   : > { %v2394_v0 = vpop.f32.mrf.mxu1 }
 0xe72   : > { %v2395_v11 = vadd.f32 %v3230_v63, %v2394_v0 }
 0xe74   : > { %2397 = vst [vmem:[%s551_s15] sm:$0x3] %v2395_v11 }
 0xe75 PF: > { %s4577_s30 = sld [smem:[#allocation21_spill]] }
 0xe76   : > { %s4578_s27 = sld [smem:[#allocation18_spill]] }
 0xe77   : > { %s4579_s28 = sld [smem:[#allocation19_spill]] }
 0xe78   : > { %s4580_s29 = sld [smem:[#allocation22_spill]] }
 0xe7b   : > { %p27_p8 = scmp.ge.s32.totalorder %s4577_s30, 7  }
 0xe7d   :  { %29 = sbr.rel (!%p27_p8) target bundleno = 15 (0xf), region = 164 }
 0xe82   :  { %2417 = vsyncpa [#allocation4], 1 }
 0xe83   :  { %2419 = vsyncpa [#allocation4 + $0x1], 1 }
 0xe84   :  { %2420 = vsyncpa [#allocation6], 1 }
 0xe85   :  { %2422 = vsyncpa [#allocation6 + $0x1], 1 }
 0xe86   :  { %2423 = vsyncpa [#allocation9], 1 }
 0xe87   :  { %2425 = vsyncpa [#allocation9 + $0x1], 1 }
 0xe88   :  { %2426 = vsyncpa [#allocation12], 1 }
 0xe89   :  { %2428 = vsyncpa [#allocation12 + $0x1], 1 }

</bundles_post_ra>
